<compile_context>
chip_gen: v7x
topology: tpu7x:2x2x1
jax: 0.10.0
libtpu: 0.0.40
codegen_flags: <defaults>
</compile_context>

<pallas_src>
import functools

import jax
import jax.numpy as jnp
from jax import lax
from jax.experimental import pallas as pl
from jax.experimental.pallas import tpu as pltpu

NEG = -1.0e30  # large-negative stand-in for -inf (avoids inf-inf NaNs)


def _round_up(x, m):
    return ((x + m - 1) // m) * m


def _pick_batch_tile(b, max_tile):
    """Batch tile: whole batch when tiny, else a multiple of 8 that still leaves
    >= 2 grid steps so the 'parallel' axis can be split across v7x cores."""
    if b <= 8:
        return b
    return min(max_tile, max(8, (b // 2 // 8) * 8))


# ----------------------------------------------------------------------------
# CTC loss kernel (blank=0; torch CTCLoss(reduction='none') per sample)
# ----------------------------------------------------------------------------
def _ctc_kernel(x_ref, ext_ref, len_ref, out_ref, emit_ref):
    # x_ref    : (BT, T, C)  model dtype, class axis NOT padded
    # ext_ref  : (BT, Sp) i32 extended labels (blank,l1,blank,l2,...), 0 beyond 2L+1
    # len_ref  : (BT, 1)  i32 target lengths
    # out_ref  : (BT, 128) f32 per-sample NLL broadcast across lanes (lane-dense)
    # emit_ref : (T, BT, Sp) f32 scratch, time-leading emission log-probs
    x = x_ref[...].astype(jnp.float32)                         # (BT, T, C)
    BT, T, C = x.shape
    Sp = ext_ref.shape[1]

    # ---- hoisted: log-softmax over classes for ALL timesteps at once --------
    m = jnp.max(x, axis=-1, keepdims=True)
    z = x - m
    lp = z - jnp.log(jnp.sum(jnp.exp(z), axis=-1, keepdims=True))   # (BT,T,C)

    # ---- hoisted: emission gather emit[b,t,s] = lp[b,t,ext[b,s]] as ONE MXU
    # einsum against an in-kernel one-hot.  bf16 operands: the one-hot is exact
    # 0/1 and the lp truncation matches default MXU precision; halves VMEM.
    # (Fall back to f32 + precision=HIGHEST here if long-T parity ever drifts.)
    ext = ext_ref[...]                                          # (BT, Sp)
    c_iota = lax.broadcasted_iota(jnp.int32, (1, 1, C), 2)      # tiny iota
    onehot = ((c_iota == ext[:, :, None])
              .astype(jnp.float32).astype(jnp.bfloat16))        # (BT, Sp, C)
    e = jnp.einsum("btc,bsc->bts", lp.astype(jnp.bfloat16), onehot,
                   preferred_element_type=jnp.float32)          # (BT, T, Sp)
    # Time-leading scratch: every recursion step reads a whole (BT,Sp) tile
    # instead of extracting one sublane per (T,Sp) tile on the critical path.
    for t in range(T):
        emit_ref[t] = e[:, t, :]

    # ---- masks derived in-kernel (no skip/final HBM inputs) -----------------
    s_iota = lax.broadcasted_iota(jnp.int32, (BT, Sp), 1)
    mask1 = s_iota >= 1
    mask2 = jnp.logical_and(
        s_iota >= 2,
        jnp.logical_and(ext != 0, ext != pltpu.roll(ext, shift=2, axis=1)))
    two_l = 2 * len_ref[...]                                    # (BT, 1)
    final = jnp.logical_or(s_iota == two_l, s_iota == two_l - 1)

    # ---- serial alpha recursion: only (BT,Sp) lane ops + XLU rolls ----------
    def step(alpha, em):
        a1 = jnp.where(mask1, pltpu.roll(alpha, shift=1, axis=1), NEG)
        a2 = jnp.where(mask2, pltpu.roll(alpha, shift=2, axis=1), NEG)
        mx = jnp.maximum(jnp.maximum(alpha, a1), a2)
        return (mx + jnp.log(jnp.exp(alpha - mx) + jnp.exp(a1 - mx)
                             + jnp.exp(a2 - mx)) + em)

    alpha = jnp.where(s_iota < 2, emit_ref[0], NEG)
    if T <= 32:
        # fully unrolled: LLO can interleave roll/exp work of adjacent steps
        for t in range(1, T):
            alpha = step(alpha, emit_ref[t])
    else:
        # bound vreg live ranges at large T while keeping some LLO visibility
        alpha = lax.fori_loop(1, T, lambda t, a: step(a, emit_ref[t]), alpha,
                              unroll=4)

    fin = jnp.where(final, alpha, NEG)
    mf = jnp.max(fin, axis=-1, keepdims=True)                   # (BT, 1)
    ll = mf + jnp.log(jnp.sum(jnp.exp(fin - mf), axis=-1, keepdims=True))
    out_ref[...] = jnp.broadcast_to(-ll, out_ref.shape)         # lane-dense store


def ctc_loss(logits_btc, labels, lengths, batch_tile=32):
    """predicts['ctc'] is (B, T, C); mirrors easycv CTCLoss (blank=0, mean over B).
    Logits are read in place: no C/B padding, no transpose, no host upcast."""
    B, T, C = logits_btc.shape
    L = labels.shape[1]
    Sp = _round_up(2 * L + 1, 128)
    BT = _pick_batch_tile(B, batch_tile)
    grid = -(-B // BT)

    labels = labels.astype(jnp.int32)
    ext = jnp.zeros((B, Sp), jnp.int32).at[:, 1:2 * L + 1:2].set(labels)
    len_col = lengths.astype(jnp.int32).reshape(B, 1)

    nll = pl.pallas_call(
        _ctc_kernel,
        out_shape=jax.ShapeDtypeStruct((B, 128), jnp.float32),
        grid_spec=pltpu.PrefetchScalarGridSpec(
            num_scalar_prefetch=0,
            grid=(grid,),
            in_specs=[
                pl.BlockSpec((BT, T, C), lambda i: (i, 0, 0)),
                pl.BlockSpec((BT, Sp), lambda i: (i, 0)),
                pl.BlockSpec((BT, 1), lambda i: (i, 0)),
            ],
            out_specs=pl.BlockSpec((BT, 128), lambda i: (i, 0)),
            scratch_shapes=[pltpu.VMEM((T, BT, Sp), jnp.float32)],
        ),
        compiler_params=pltpu.CompilerParams(
            dimension_semantics=("parallel",),      # batch tiles are independent
            vmem_limit_bytes=48 * 1024 * 1024,      # v7x-safe, > v5e 16 MiB default
        ),
    )(logits_btc, ext, len_col)
    # Per-sample NLL (no target-length normalization), mean over batch --
    # matches easycv CTCLoss(reduction='none').mean().
    # TODO(synk): assumes all T frames are valid (preds_lengths == T), as easycv does.
    return jnp.mean(nll[:, 0])


# ----------------------------------------------------------------------------
# SAR loss kernel (CrossEntropyLoss, reduction='mean', ignore_index)
# ----------------------------------------------------------------------------
def _sar_kernel(x_ref, t_ref, num_ref, *, ignore_index, batch):
    # x_ref  : (Bb, T_sar, C) model dtype (original logits tile, incl. last step)
    # t_ref  : (Bb, T_sar, 1) int32 labels
    # num_ref: (1, 8, 128) f32 lane-dense per-tile partial sum of masked CE
    b_blk, t_full, c = x_ref.shape
    tm1 = t_full - 1
    x = x_ref[:, :tm1, :].astype(jnp.float32)       # drop last decode step
    lab = t_ref[:, 1:t_full, :]                     # drop first token (Bb,tm1,1)

    if batch % b_blk != 0:   # sanitize OOB rows of the edge block (trace-time cond)
        b_iota = lax.broadcasted_iota(jnp.int32, (b_blk, 1, 1), 0)
        row_ok = (pl.program_id(0) * b_blk + b_iota) < batch
        x = jnp.where(row_ok, x, 0.0)
        lab = jnp.where(row_ok, lab, ignore_index)

    m = jnp.max(x, axis=-1, keepdims=True)
    z = x - m
    lse = jnp.log(jnp.sum(jnp.exp(z), axis=-1, keepdims=True))      # (Bb,tm1,1)
    c_iota = lax.broadcasted_iota(jnp.int32, (1, 1, c), 2)          # tiny iota
    picked = jnp.sum(jnp.where(c_iota == lab, z, 0.0),              # fused one-hot pick
                     axis=-1, keepdims=True)                        # (Bb,tm1,1)
    ce = lse - picked
    valid = (lab != ignore_index).astype(jnp.float32)
    num_ref[...] = jnp.full(num_ref.shape, jnp.sum(ce * valid), jnp.float32)


def sar_loss(logits_bsc, label_sar, ignore_index, target_block_bytes=2 * 1024 * 1024):
    """predicts['sar'] is (B, T_sar, C); mirrors easycv SARLoss
    (CrossEntropyLoss(ignore_index, 'mean') on predicts[:, :-1] vs labels[:, 1:]).
    Logits are read in place -- no slice/reshape/pad copy."""
    B, T_sar, C = logits_bsc.shape
    label3 = label_sar.astype(jnp.int32).reshape(B, T_sar, 1)
    # Denominator = #valid targets; computed on the tiny label array outside.
    den = jnp.sum((label3[:, 1:, 0] != ignore_index).astype(jnp.float32))

    row_bytes = T_sar * C * logits_bsc.dtype.itemsize
    bb = max(1, min(B, target_block_bytes // max(1, row_bytes)))
    if bb >= B and B > 1:
        bb = (B + 1) // 2        # keep >= 2 grid steps (megacore on v7x)
    grid = -(-B // bb)

    kernel = functools.partial(_sar_kernel, ignore_index=int(ignore_index), batch=B)
    num_part = pl.pallas_call(
        kernel,
        out_shape=jax.ShapeDtypeStruct((grid, 8, 128), jnp.float32),
        grid_spec=pltpu.PrefetchScalarGridSpec(
            num_scalar_prefetch=0,
            grid=(grid,),
            in_specs=[
                pl.BlockSpec((bb, T_sar, C), lambda i: (i, 0, 0)),
                pl.BlockSpec((bb, T_sar, 1), lambda i: (i, 0, 0)),
            ],
            out_specs=pl.BlockSpec((1, 8, 128), lambda i: (i, 0, 0)),
        ),
        compiler_params=pltpu.CompilerParams(
            dimension_semantics=("parallel",),      # per-tile partials, no carry
            vmem_limit_bytes=32 * 1024 * 1024,
        ),
    )(logits_bsc, label3)
    num = jnp.sum(num_part[:, 0, 0])
    # TODO(synk): torch CrossEntropyLoss yields NaN when every target is
    # ignore_index; we guard the denominator with max(den, 1) instead.
    return num / jnp.maximum(den, 1.0)


# ----------------------------------------------------------------------------
# MultiLoss wrapper (same forward semantics as the PyTorch module)
# ----------------------------------------------------------------------------
class _CTCLoss:
    def __init__(self, **kwargs):
        pass

    def __call__(self, predicts, labels, lengths):
        return {"loss": ctc_loss(predicts, labels, lengths)}


class _SARLoss:
    def __init__(self, **kwargs):
        self.ignore_index = int(kwargs.get("ignore_index", 92))

    def __call__(self, predicts, labels):
        return {"loss": sar_loss(predicts, labels, self.ignore_index)}


class MultiLoss:
    # Static registry replaces the PyTorch module's eval()-based construction.
    _REGISTRY = {"CTCLoss": _CTCLoss, "SARLoss": _SARLoss}

    def __init__(self, loss_config_list, weight_1=1.0, weight_2=1.0,
                 gtc_loss="sar", **kwargs):
        self.loss_funcs = {}
        self.loss_list = loss_config_list
        self.weight_1 = weight_1
        self.weight_2 = weight_2
        self.gtc_loss = gtc_loss
        for loss_info in self.loss_list:
            for name, param in loss_info.items():
                if param is not None:
                    kwargs.update(param)
                self.loss_funcs[name] = self._REGISTRY[name](**kwargs)

    def forward(self, predicts, label_ctc=None, label_sar=None, length=None):
        self.total_loss = {}
        total_loss = 0.0
        for name, loss_func in self.loss_funcs.items():
            if name == "CTCLoss":
                loss = loss_func(predicts["ctc"], label_ctc, length)["loss"] * self.weight_1
            elif name == "SARLoss":
                loss = loss_func(predicts["sar"], label_sar)["loss"] * self.weight_2
            else:
                raise NotImplementedError(
                    "{} is not supported in MultiLoss yet".format(name))
            self.total_loss[name] = loss
            total_loss = total_loss + loss
        self.total_loss["loss"] = total_loss
        return self.total_loss

    __call__ = forward


if __name__ == "__main__":
    key = jax.random.PRNGKey(0)
    k1, k2, k3, k4 = jax.random.split(key, 4)

    B = 2
    T_CTC = 16      # CTC time steps
    C = 96          # num classes (class 0 = CTC blank; 92 = SAR ignore_index)
    L_MAX = 6       # max CTC label length  -> S = 13 (lanes padded to 128)
    T_SAR = 9       # SAR decode steps (last step dropped inside the loss)
    IGNORE = 92

    ctc_logits = jax.random.normal(k1, (B, T_CTC, C), dtype=jnp.float32)
    sar_logits = jax.random.normal(k2, (B, T_SAR, C), dtype=jnp.float32)

    lengths = jnp.array([4, 6], dtype=jnp.int32)
    raw_labels = jax.random.randint(k3, (B, L_MAX), 1, C)
    pos = jnp.arange(L_MAX)[None, :]
    label_ctc = jnp.where(pos < lengths[:, None], raw_labels, 0).astype(jnp.int32)

    raw_sar = jax.random.randint(k4, (B, T_SAR), 0, C - 4)
    sar_valid = jnp.array([6, 9], dtype=jnp.int32)
    label_sar = jnp.where(jnp.arange(T_SAR)[None, :] < sar_valid[:, None],
                          raw_sar, IGNORE).astype(jnp.int32)

    loss_mod = MultiLoss([{"CTCLoss": None}, {"SARLoss": None}],
                         weight_1=1.0, weight_2=1.0, gtc_loss="sar",
                         ignore_index=IGNORE)

    # Single jit: both pallas_calls share one dispatch / XLA program.
    run = jax.jit(lambda preds, lc, ls, ln: loss_mod(
        preds, label_ctc=lc, label_sar=ls, length=ln))
    out = run({"ctc": ctc_logits, "sar": sar_logits}, label_ctc, label_sar, lengths)

    jax.block_until_ready(out["loss"])
    print("KERNEL_OK")
</pallas_src>

<mosaic_0001>
module attributes {stable_mosaic.version = 11 : i64} {
  func.func @_sar_kernel(%arg0: i32, %arg1: memref<1x9x96xf32, #tpu.memory_space<vmem>>, %arg2: memref<1x9x1xi32, #tpu.memory_space<vmem>>, %arg3: memref<1x8x128xf32, #tpu.memory_space<vmem>>) attributes {dimension_semantics = [#tpu.dimension_semantics<parallel>], iteration_bounds = array<i64: 2>, scalar_prefetch = 0 : i64, scratch_operands = 0 : i64, tpu.core_type = #tpu.core_type<tc>, window_params = [{transform_indices = @transform_0, window_bounds = array<i64: 1, 9, 96>}, {transform_indices = @transform_1, window_bounds = array<i64: 1, 9, 1>}, {transform_indices = @transform_2, window_bounds = array<i64: 1, 8, 128>}]} {
    %c0 = arith.constant 0 : index
    %c0_0 = arith.constant 0 : index
    %c0_1 = arith.constant 0 : index
    %0 = vector.load %arg1[%c0, %c0_0, %c0_1] : memref<1x9x96xf32, #tpu.memory_space<vmem>>, vector<1x8x96xf32>
    %c0_2 = arith.constant 0 : index
    %c1 = arith.constant 1 : index
    %c0_3 = arith.constant 0 : index
    %1 = vector.load %arg2[%c0_2, %c1, %c0_3] : memref<1x9x1xi32, #tpu.memory_space<vmem>>, vector<1x8x1xi32>
    %cst = arith.constant dense<0xFF800000> : vector<1x8xf32>
    %2 = vector.multi_reduction <maximumf>, %0, %cst [2] : vector<1x8x96xf32> to vector<1x8xf32>
    %3 = vector.shape_cast %2 : vector<1x8xf32> to vector<1x8x1xf32>
    %4 = vector.broadcast %3 : vector<1x8x1xf32> to vector<1x8x96xf32>
    %5 = arith.subf %0, %4 : vector<1x8x96xf32>
    %6 = math.exp %5 : vector<1x8x96xf32>
    %cst_4 = arith.constant dense<0.000000e+00> : vector<1x8xf32>
    %7 = vector.multi_reduction <add>, %6, %cst_4 [2] : vector<1x8x96xf32> to vector<1x8xf32>
    %8 = vector.shape_cast %7 : vector<1x8xf32> to vector<1x8x1xf32>
    %9 = math.log %8 : vector<1x8x1xf32>
    %10 = tpu.iota {dimensions = array<i32: 2>} : vector<1x1x96xi32>
    %11 = vector.broadcast %10 : vector<1x1x96xi32> to vector<1x8x96xi32>
    %12 = vector.broadcast %1 : vector<1x8x1xi32> to vector<1x8x96xi32>
    %13 = arith.cmpi eq, %11, %12 : vector<1x8x96xi32>
    %cst_5 = arith.constant 0.000000e+00 : f32
    %14 = vector.broadcast %cst_5 : f32 to vector<1x8x96xf32>
    %15 = arith.select %13, %5, %14 : vector<1x8x96xi1>, vector<1x8x96xf32>
    %cst_6 = arith.constant dense<0.000000e+00> : vector<1x8xf32>
    %16 = vector.multi_reduction <add>, %15, %cst_6 [2] : vector<1x8x96xf32> to vector<1x8xf32>
    %17 = vector.shape_cast %16 : vector<1x8xf32> to vector<1x8x1xf32>
    %18 = arith.subf %9, %17 : vector<1x8x1xf32>
    %c92_i32 = arith.constant 92 : i32
    %19 = vector.broadcast %c92_i32 : i32 to vector<1x8x1xi32>
    %20 = arith.cmpi ne, %1, %19 : vector<1x8x1xi32>
    %21 = arith.extui %20 : vector<1x8x1xi1> to vector<1x8x1xi32>
    %22 = arith.sitofp %21 : vector<1x8x1xi32> to vector<1x8x1xf32>
    %23 = arith.mulf %18, %22 : vector<1x8x1xf32>
    %24 = vector.shape_cast %23 : vector<1x8x1xf32> to vector<1x1x8x1xf32>
    %cst_7 = arith.constant dense<0.000000e+00> : vector<1xf32>
    %25 = vector.multi_reduction <add>, %24, %cst_7 [1, 2, 3] : vector<1x1x8x1xf32> to vector<1xf32>
    %26 = vector.shape_cast %25 : vector<1xf32> to vector<1x1x1x1xf32>
    %27 = vector.extract %26[0, 0, 0, 0] : f32 from vector<1x1x1x1xf32>
    %28 = vector.broadcast %27 : f32 to vector<1x8x128xf32>
    %c0_8 = arith.constant 0 : index
    %c0_9 = arith.constant 0 : index
    %c0_10 = arith.constant 0 : index
    %29 = vector.load %arg3[%c0_8, %c0_9, %c0_10] : memref<1x8x128xf32, #tpu.memory_space<vmem>>, vector<1x8x128xf32>
    tpu.vector_store %arg3[%c0_8, %c0_9, %c0_10], %28 {strides = array<i32>} : memref<1x8x128xf32, #tpu.memory_space<vmem>>, vector<1x8x128xf32>,
    return
  }
  func.func @transform_0(%arg0: i32) -> (i32, i32, i32) {
    %c0_i32 = arith.constant 0 : i32
    %c0_i32_0 = arith.constant 0 : i32
    %c0_i32_1 = arith.constant 0 : i32
    return %arg0, %c0_i32, %c0_i32_0 : i32, i32, i32
  }
  func.func @transform_1(%arg0: i32) -> (i32, i32, i32) {
    %c0_i32 = arith.constant 0 : i32
    %c0_i32_0 = arith.constant 0 : i32
    %c0_i32_1 = arith.constant 0 : i32
    return %arg0, %c0_i32, %c0_i32_0 : i32, i32, i32
  }
  func.func @transform_2(%arg0: i32) -> (i32, i32, i32) {
    %c0_i32 = arith.constant 0 : i32
    %c0_i32_0 = arith.constant 0 : i32
    %c0_i32_1 = arith.constant 0 : i32
    return %arg0, %c0_i32, %c0_i32_0 : i32, i32, i32
  }
}

module attributes {stable_mosaic.version = 11 : i64} {
  func.func @_ctc_kernel(%arg0: i32, %arg1: memref<2x16x96xf32, #tpu.memory_space<vmem>>, %arg2: memref<2x128xi32, #tpu.memory_space<vmem>>, %arg3: memref<2x1xi32, #tpu.memory_space<vmem>>, %arg4: memref<2x128xf32, #tpu.memory_space<vmem>>, %arg5: memref<16x2x128xf32, #tpu.memory_space<vmem>>) attributes {dimension_semantics = [#tpu.dimension_semantics<parallel>], iteration_bounds = array<i64: 1>, scalar_prefetch = 0 : i64, scratch_operands = 1 : i64, tpu.core_type = #tpu.core_type<tc>, window_params = [{transform_indices = @transform_0, window_bounds = array<i64: 2, 16, 96>}, {transform_indices = @transform_1, window_bounds = array<i64: 2, 128>}, {transform_indices = @transform_2, window_bounds = array<i64: 2, 1>}, {transform_indices = @transform_3, window_bounds = array<i64: 2, 128>}]} {
    %c0 = arith.constant 0 : index
    %c0_0 = arith.constant 0 : index
    %c0_1 = arith.constant 0 : index
    %0 = vector.load %arg1[%c0, %c0_0, %c0_1] : memref<2x16x96xf32, #tpu.memory_space<vmem>>, vector<2x16x96xf32>
    %cst = arith.constant dense<0xFF800000> : vector<2x16xf32>
    %1 = vector.multi_reduction <maximumf>, %0, %cst [2] : vector<2x16x96xf32> to vector<2x16xf32>
    %2 = vector.shape_cast %1 : vector<2x16xf32> to vector<2x16x1xf32>
    %3 = vector.broadcast %2 : vector<2x16x1xf32> to vector<2x16x96xf32>
    %4 = arith.subf %0, %3 : vector<2x16x96xf32>
    %5 = math.exp %4 : vector<2x16x96xf32>
    %cst_2 = arith.constant dense<0.000000e+00> : vector<2x16xf32>
    %6 = vector.multi_reduction <add>, %5, %cst_2 [2] : vector<2x16x96xf32> to vector<2x16xf32>
    %7 = vector.shape_cast %6 : vector<2x16xf32> to vector<2x16x1xf32>
    %8 = math.log %7 : vector<2x16x1xf32>
    %9 = vector.broadcast %8 : vector<2x16x1xf32> to vector<2x16x96xf32>
    %10 = arith.subf %4, %9 : vector<2x16x96xf32>
    %c0_3 = arith.constant 0 : index
    %c0_4 = arith.constant 0 : index
    %11 = vector.load %arg2[%c0_3, %c0_4] : memref<2x128xi32, #tpu.memory_space<vmem>>, vector<2x128xi32>
    %12 = tpu.iota {dimensions = array<i32: 2>} : vector<1x1x96xi32>
    %13 = vector.shape_cast %11 : vector<2x128xi32> to vector<2x128x1xi32>
    %14 = vector.broadcast %12 : vector<1x1x96xi32> to vector<2x128x96xi32>
    %15 = vector.broadcast %13 : vector<2x128x1xi32> to vector<2x128x96xi32>
    %16 = arith.cmpi eq, %14, %15 : vector<2x128x96xi32>
    %17 = arith.extui %16 : vector<2x128x96xi1> to vector<2x128x96xi32>
    %18 = arith.sitofp %17 : vector<2x128x96xi32> to vector<2x128x96xf32>
    %19 = arith.truncf %18 : vector<2x128x96xf32> to vector<2x128x96xbf16>
    %20 = arith.truncf %10 : vector<2x16x96xf32> to vector<2x16x96xbf16>
    "tpu.trace_start"() <{level = 10 : i32, message = "btc,bsc->bts"}> : () -> ()
    %cst_5 = arith.constant dense<0.000000e+00> : vector<2x16x128xf32>
    %21 = tpu.matmul %20, %19, %cst_5 {dimension_numbers = #tpu.dot_dimension_numbers<[2], [2], [1], [1], [0, 0, 0, 1, 1, 1], [0], [0]>} : vector<2x16x96xbf16>, vector<2x128x96xbf16>, vector<2x16x128xf32> -> vector<2x16x128xf32>
    "tpu.trace_stop"() : () -> ()
    %22 = vector.extract_strided_slice %21 {offsets = [0, 0, 0], sizes = [2, 1, 128], strides = [1, 1, 1]} : vector<2x16x128xf32> to vector<2x1x128xf32>
    %23 = vector.shape_cast %22 : vector<2x1x128xf32> to vector<2x128xf32>
    %c0_6 = arith.constant 0 : index
    %c0_7 = arith.constant 0 : index
    %c0_8 = arith.constant 0 : index
    %24 = vector.load %arg5[%c0_6, %c0_7, %c0_8] : memref<16x2x128xf32, #tpu.memory_space<vmem>>, vector<1x2x128xf32>
    %25 = vector.shape_cast %24 : vector<1x2x128xf32> to vector<2x128xf32>
    %26 = vector.shape_cast %23 : vector<2x128xf32> to vector<1x2x128xf32>
    tpu.vector_store %arg5[%c0_6, %c0_7, %c0_8], %26 {strides = array<i32>} : memref<16x2x128xf32, #tpu.memory_space<vmem>>, vector<1x2x128xf32>,
    %27 = vector.extract_strided_slice %21 {offsets = [0, 1, 0], sizes = [2, 1, 128], strides = [1, 1, 1]} : vector<2x16x128xf32> to vector<2x1x128xf32>
    %28 = vector.shape_cast %27 : vector<2x1x128xf32> to vector<2x128xf32>
    %c1 = arith.constant 1 : index
    %c0_9 = arith.constant 0 : index
    %c0_10 = arith.constant 0 : index
    %29 = vector.load %arg5[%c1, %c0_9, %c0_10] : memref<16x2x128xf32, #tpu.memory_space<vmem>>, vector<1x2x128xf32>
    %30 = vector.shape_cast %29 : vector<1x2x128xf32> to vector<2x128xf32>
    %31 = vector.shape_cast %28 : vector<2x128xf32> to vector<1x2x128xf32>
    tpu.vector_store %arg5[%c1, %c0_9, %c0_10], %31 {strides = array<i32>} : memref<16x2x128xf32, #tpu.memory_space<vmem>>, vector<1x2x128xf32>,
    %32 = vector.extract_strided_slice %21 {offsets = [0, 2, 0], sizes = [2, 1, 128], strides = [1, 1, 1]} : vector<2x16x128xf32> to vector<2x1x128xf32>
    %33 = vector.shape_cast %32 : vector<2x1x128xf32> to vector<2x128xf32>
    %c2 = arith.constant 2 : index
    %c0_11 = arith.constant 0 : index
    %c0_12 = arith.constant 0 : index
    %34 = vector.load %arg5[%c2, %c0_11, %c0_12] : memref<16x2x128xf32, #tpu.memory_space<vmem>>, vector<1x2x128xf32>
    %35 = vector.shape_cast %34 : vector<1x2x128xf32> to vector<2x128xf32>
    %36 = vector.shape_cast %33 : vector<2x128xf32> to vector<1x2x128xf32>
    tpu.vector_store %arg5[%c2, %c0_11, %c0_12], %36 {strides = array<i32>} : memref<16x2x128xf32, #tpu.memory_space<vmem>>, vector<1x2x128xf32>,
    %37 = vector.extract_strided_slice %21 {offsets = [0, 3, 0], sizes = [2, 1, 128], strides = [1, 1, 1]} : vector<2x16x128xf32> to vector<2x1x128xf32>
    %38 = vector.shape_cast %37 : vector<2x1x128xf32> to vector<2x128xf32>
    %c3 = arith.constant 3 : index
    %c0_13 = arith.constant 0 : index
    %c0_14 = arith.constant 0 : index
    %39 = vector.load %arg5[%c3, %c0_13, %c0_14] : memref<16x2x128xf32, #tpu.memory_space<vmem>>, vector<1x2x128xf32>
    %40 = vector.shape_cast %39 : vector<1x2x128xf32> to vector<2x128xf32>
    %41 = vector.shape_cast %38 : vector<2x128xf32> to vector<1x2x128xf32>
    tpu.vector_store %arg5[%c3, %c0_13, %c0_14], %41 {strides = array<i32>} : memref<16x2x128xf32, #tpu.memory_space<vmem>>, vector<1x2x128xf32>,
    %42 = vector.extract_strided_slice %21 {offsets = [0, 4, 0], sizes = [2, 1, 128], strides = [1, 1, 1]} : vector<2x16x128xf32> to vector<2x1x128xf32>
    %43 = vector.shape_cast %42 : vector<2x1x128xf32> to vector<2x128xf32>
    %c4 = arith.constant 4 : index
    %c0_15 = arith.constant 0 : index
    %c0_16 = arith.constant 0 : index
    %44 = vector.load %arg5[%c4, %c0_15, %c0_16] : memref<16x2x128xf32, #tpu.memory_space<vmem>>, vector<1x2x128xf32>
    %45 = vector.shape_cast %44 : vector<1x2x128xf32> to vector<2x128xf32>
    %46 = vector.shape_cast %43 : vector<2x128xf32> to vector<1x2x128xf32>
    tpu.vector_store %arg5[%c4, %c0_15, %c0_16], %46 {strides = array<i32>} : memref<16x2x128xf32, #tpu.memory_space<vmem>>, vector<1x2x128xf32>,
    %47 = vector.extract_strided_slice %21 {offsets = [0, 5, 0], sizes = [2, 1, 128], strides = [1, 1, 1]} : vector<2x16x128xf32> to vector<2x1x128xf32>
    %48 = vector.shape_cast %47 : vector<2x1x128xf32> to vector<2x128xf32>
    %c5 = arith.constant 5 : index
    %c0_17 = arith.constant 0 : index
    %c0_18 = arith.constant 0 : index
    %49 = vector.load %arg5[%c5, %c0_17, %c0_18] : memref<16x2x128xf32, #tpu.memory_space<vmem>>, vector<1x2x128xf32>
    %50 = vector.shape_cast %49 : vector<1x2x128xf32> to vector<2x128xf32>
    %51 = vector.shape_cast %48 : vector<2x128xf32> to vector<1x2x128xf32>
    tpu.vector_store %arg5[%c5, %c0_17, %c0_18], %51 {strides = array<i32>} : memref<16x2x128xf32, #tpu.memory_space<vmem>>, vector<1x2x128xf32>,
    %52 = vector.extract_strided_slice %21 {offsets = [0, 6, 0], sizes = [2, 1, 128], strides = [1, 1, 1]} : vector<2x16x128xf32> to vector<2x1x128xf32>
    %53 = vector.shape_cast %52 : vector<2x1x128xf32> to vector<2x128xf32>
    %c6 = arith.constant 6 : index
    %c0_19 = arith.constant 0 : index
    %c0_20 = arith.constant 0 : index
    %54 = vector.load %arg5[%c6, %c0_19, %c0_20] : memref<16x2x128xf32, #tpu.memory_space<vmem>>, vector<1x2x128xf32>
    %55 = vector.shape_cast %54 : vector<1x2x128xf32> to vector<2x128xf32>
    %56 = vector.shape_cast %53 : vector<2x128xf32> to vector<1x2x128xf32>
    tpu.vector_store %arg5[%c6, %c0_19, %c0_20], %56 {strides = array<i32>} : memref<16x2x128xf32, #tpu.memory_space<vmem>>, vector<1x2x128xf32>,
    %57 = vector.extract_strided_slice %21 {offsets = [0, 7, 0], sizes = [2, 1, 128], strides = [1, 1, 1]} : vector<2x16x128xf32> to vector<2x1x128xf32>
    %58 = vector.shape_cast %57 : vector<2x1x128xf32> to vector<2x128xf32>
    %c7 = arith.constant 7 : index
    %c0_21 = arith.constant 0 : index
    %c0_22 = arith.constant 0 : index
    %59 = vector.load %arg5[%c7, %c0_21, %c0_22] : memref<16x2x128xf32, #tpu.memory_space<vmem>>, vector<1x2x128xf32>
    %60 = vector.shape_cast %59 : vector<1x2x128xf32> to vector<2x128xf32>
    %61 = vector.shape_cast %58 : vector<2x128xf32> to vector<1x2x128xf32>
    tpu.vector_store %arg5[%c7, %c0_21, %c0_22], %61 {strides = array<i32>} : memref<16x2x128xf32, #tpu.memory_space<vmem>>, vector<1x2x128xf32>,
    %62 = vector.extract_strided_slice %21 {offsets = [0, 8, 0], sizes = [2, 1, 128], strides = [1, 1, 1]} : vector<2x16x128xf32> to vector<2x1x128xf32>
    %63 = vector.shape_cast %62 : vector<2x1x128xf32> to vector<2x128xf32>
    %c8 = arith.constant 8 : index
    %c0_23 = arith.constant 0 : index
    %c0_24 = arith.constant 0 : index
    %64 = vector.load %arg5[%c8, %c0_23, %c0_24] : memref<16x2x128xf32, #tpu.memory_space<vmem>>, vector<1x2x128xf32>
    %65 = vector.shape_cast %64 : vector<1x2x128xf32> to vector<2x128xf32>
    %66 = vector.shape_cast %63 : vector<2x128xf32> to vector<1x2x128xf32>
    tpu.vector_store %arg5[%c8, %c0_23, %c0_24], %66 {strides = array<i32>} : memref<16x2x128xf32, #tpu.memory_space<vmem>>, vector<1x2x128xf32>,
    %67 = vector.extract_strided_slice %21 {offsets = [0, 9, 0], sizes = [2, 1, 128], strides = [1, 1, 1]} : vector<2x16x128xf32> to vector<2x1x128xf32>
    %68 = vector.shape_cast %67 : vector<2x1x128xf32> to vector<2x128xf32>
    %c9 = arith.constant 9 : index
    %c0_25 = arith.constant 0 : index
    %c0_26 = arith.constant 0 : index
    %69 = vector.load %arg5[%c9, %c0_25, %c0_26] : memref<16x2x128xf32, #tpu.memory_space<vmem>>, vector<1x2x128xf32>
    %70 = vector.shape_cast %69 : vector<1x2x128xf32> to vector<2x128xf32>
    %71 = vector.shape_cast %68 : vector<2x128xf32> to vector<1x2x128xf32>
    tpu.vector_store %arg5[%c9, %c0_25, %c0_26], %71 {strides = array<i32>} : memref<16x2x128xf32, #tpu.memory_space<vmem>>, vector<1x2x128xf32>,
    %72 = vector.extract_strided_slice %21 {offsets = [0, 10, 0], sizes = [2, 1, 128], strides = [1, 1, 1]} : vector<2x16x128xf32> to vector<2x1x128xf32>
    %73 = vector.shape_cast %72 : vector<2x1x128xf32> to vector<2x128xf32>
    %c10 = arith.constant 10 : index
    %c0_27 = arith.constant 0 : index
    %c0_28 = arith.constant 0 : index
    %74 = vector.load %arg5[%c10, %c0_27, %c0_28] : memref<16x2x128xf32, #tpu.memory_space<vmem>>, vector<1x2x128xf32>
    %75 = vector.shape_cast %74 : vector<1x2x128xf32> to vector<2x128xf32>
    %76 = vector.shape_cast %73 : vector<2x128xf32> to vector<1x2x128xf32>
    tpu.vector_store %arg5[%c10, %c0_27, %c0_28], %76 {strides = array<i32>} : memref<16x2x128xf32, #tpu.memory_space<vmem>>, vector<1x2x128xf32>,
    %77 = vector.extract_strided_slice %21 {offsets = [0, 11, 0], sizes = [2, 1, 128], strides = [1, 1, 1]} : vector<2x16x128xf32> to vector<2x1x128xf32>
    %78 = vector.shape_cast %77 : vector<2x1x128xf32> to vector<2x128xf32>
    %c11 = arith.constant 11 : index
    %c0_29 = arith.constant 0 : index
    %c0_30 = arith.constant 0 : index
    %79 = vector.load %arg5[%c11, %c0_29, %c0_30] : memref<16x2x128xf32, #tpu.memory_space<vmem>>, vector<1x2x128xf32>
    %80 = vector.shape_cast %79 : vector<1x2x128xf32> to vector<2x128xf32>
    %81 = vector.shape_cast %78 : vector<2x128xf32> to vector<1x2x128xf32>
    tpu.vector_store %arg5[%c11, %c0_29, %c0_30], %81 {strides = array<i32>} : memref<16x2x128xf32, #tpu.memory_space<vmem>>, vector<1x2x128xf32>,
    %82 = vector.extract_strided_slice %21 {offsets = [0, 12, 0], sizes = [2, 1, 128], strides = [1, 1, 1]} : vector<2x16x128xf32> to vector<2x1x128xf32>
    %83 = vector.shape_cast %82 : vector<2x1x128xf32> to vector<2x128xf32>
    %c12 = arith.constant 12 : index
    %c0_31 = arith.constant 0 : index
    %c0_32 = arith.constant 0 : index
    %84 = vector.load %arg5[%c12, %c0_31, %c0_32] : memref<16x2x128xf32, #tpu.memory_space<vmem>>, vector<1x2x128xf32>
    %85 = vector.shape_cast %84 : vector<1x2x128xf32> to vector<2x128xf32>
    %86 = vector.shape_cast %83 : vector<2x128xf32> to vector<1x2x128xf32>
    tpu.vector_store %arg5[%c12, %c0_31, %c0_32], %86 {strides = array<i32>} : memref<16x2x128xf32, #tpu.memory_space<vmem>>, vector<1x2x128xf32>,
    %87 = vector.extract_strided_slice %21 {offsets = [0, 13, 0], sizes = [2, 1, 128], strides = [1, 1, 1]} : vector<2x16x128xf32> to vector<2x1x128xf32>
    %88 = vector.shape_cast %87 : vector<2x1x128xf32> to vector<2x128xf32>
    %c13 = arith.constant 13 : index
    %c0_33 = arith.constant 0 : index
    %c0_34 = arith.constant 0 : index
    %89 = vector.load %arg5[%c13, %c0_33, %c0_34] : memref<16x2x128xf32, #tpu.memory_space<vmem>>, vector<1x2x128xf32>
    %90 = vector.shape_cast %89 : vector<1x2x128xf32> to vector<2x128xf32>
    %91 = vector.shape_cast %88 : vector<2x128xf32> to vector<1x2x128xf32>
    tpu.vector_store %arg5[%c13, %c0_33, %c0_34], %91 {strides = array<i32>} : memref<16x2x128xf32, #tpu.memory_space<vmem>>, vector<1x2x128xf32>,
    %92 = vector.extract_strided_slice %21 {offsets = [0, 14, 0], sizes = [2, 1, 128], strides = [1, 1, 1]} : vector<2x16x128xf32> to vector<2x1x128xf32>
    %93 = vector.shape_cast %92 : vector<2x1x128xf32> to vector<2x128xf32>
    %c14 = arith.constant 14 : index
    %c0_35 = arith.constant 0 : index
    %c0_36 = arith.constant 0 : index
    %94 = vector.load %arg5[%c14, %c0_35, %c0_36] : memref<16x2x128xf32, #tpu.memory_space<vmem>>, vector<1x2x128xf32>
    %95 = vector.shape_cast %94 : vector<1x2x128xf32> to vector<2x128xf32>
    %96 = vector.shape_cast %93 : vector<2x128xf32> to vector<1x2x128xf32>
    tpu.vector_store %arg5[%c14, %c0_35, %c0_36], %96 {strides = array<i32>} : memref<16x2x128xf32, #tpu.memory_space<vmem>>, vector<1x2x128xf32>,
    %97 = vector.extract_strided_slice %21 {offsets = [0, 15, 0], sizes = [2, 1, 128], strides = [1, 1, 1]} : vector<2x16x128xf32> to vector<2x1x128xf32>
    %98 = vector.shape_cast %97 : vector<2x1x128xf32> to vector<2x128xf32>
    %c15 = arith.constant 15 : index
    %c0_37 = arith.constant 0 : index
    %c0_38 = arith.constant 0 : index
    %99 = vector.load %arg5[%c15, %c0_37, %c0_38] : memref<16x2x128xf32, #tpu.memory_space<vmem>>, vector<1x2x128xf32>
    %100 = vector.shape_cast %99 : vector<1x2x128xf32> to vector<2x128xf32>
    %101 = vector.shape_cast %98 : vector<2x128xf32> to vector<1x2x128xf32>
    tpu.vector_store %arg5[%c15, %c0_37, %c0_38], %101 {strides = array<i32>} : memref<16x2x128xf32, #tpu.memory_space<vmem>>, vector<1x2x128xf32>,
    %102 = tpu.iota {dimensions = array<i32: 1>} : vector<2x128xi32>
    %c1_i32 = arith.constant 1 : i32
    %103 = vector.broadcast %c1_i32 : i32 to vector<2x128xi32>
    %104 = arith.cmpi sge, %102, %103 : vector<2x128xi32>
    %c2_i32 = arith.constant 2 : i32
    %105 = vector.broadcast %c2_i32 : i32 to vector<2x128xi32>
    %106 = arith.cmpi sge, %102, %105 : vector<2x128xi32>
    %c0_i32 = arith.constant 0 : i32
    %107 = vector.broadcast %c0_i32 : i32 to vector<2x128xi32>
    %108 = arith.cmpi ne, %11, %107 : vector<2x128xi32>
    %c2_i32_39 = arith.constant 2 : i32
    %109 = tpu.dynamic_rotate %11 by %c2_i32_39 dim 1 : vector<2x128xi32>, i32 -> vector<2x128xi32>
    %110 = arith.cmpi ne, %11, %109 : vector<2x128xi32>
    %111 = arith.andi %108, %110 : vector<2x128xi1>
    %112 = arith.andi %106, %111 : vector<2x128xi1>
    %c0_40 = arith.constant 0 : index
    %c0_41 = arith.constant 0 : index
    %113 = vector.load %arg3[%c0_40, %c0_41] : memref<2x1xi32, #tpu.memory_space<vmem>>, vector<2x1xi32>
    %c2_i32_42 = arith.constant 2 : i32
    %114 = vector.broadcast %c2_i32_42 : i32 to vector<2x1xi32>
    %115 = arith.muli %114, %113 : vector<2x1xi32>
    %116 = vector.broadcast %115 : vector<2x1xi32> to vector<2x128xi32>
    %117 = arith.cmpi eq, %102, %116 : vector<2x128xi32>
    %c1_i32_43 = arith.constant 1 : i32
    %118 = vector.broadcast %c1_i32_43 : i32 to vector<2x1xi32>
    %119 = arith.subi %115, %118 : vector<2x1xi32>
    %120 = vector.broadcast %119 : vector<2x1xi32> to vector<2x128xi32>
    %121 = arith.cmpi eq, %102, %120 : vector<2x128xi32>
    %122 = arith.ori %117, %121 : vector<2x128xi1>
    %c2_i32_44 = arith.constant 2 : i32
    %123 = vector.broadcast %c2_i32_44 : i32 to vector<2x128xi32>
    %124 = arith.cmpi slt, %102, %123 : vector<2x128xi32>
    %c0_45 = arith.constant 0 : index
    %c0_46 = arith.constant 0 : index
    %c0_47 = arith.constant 0 : index
    %125 = vector.load %arg5[%c0_45, %c0_46, %c0_47] : memref<16x2x128xf32, #tpu.memory_space<vmem>>, vector<1x2x128xf32>
    %126 = vector.shape_cast %125 : vector<1x2x128xf32> to vector<2x128xf32>
    %cst_48 = arith.constant -1.000000e+30 : f32
    %127 = vector.broadcast %cst_48 : f32 to vector<2x128xf32>
    %128 = arith.select %124, %126, %127 : vector<2x128xi1>, vector<2x128xf32>
    %c1_49 = arith.constant 1 : index
    %c0_50 = arith.constant 0 : index
    %c0_51 = arith.constant 0 : index
    %129 = vector.load %arg5[%c1_49, %c0_50, %c0_51] : memref<16x2x128xf32, #tpu.memory_space<vmem>>, vector<1x2x128xf32>
    %130 = vector.shape_cast %129 : vector<1x2x128xf32> to vector<2x128xf32>
    %c1_i32_52 = arith.constant 1 : i32
    %131 = tpu.dynamic_rotate %128 by %c1_i32_52 dim 1 : vector<2x128xf32>, i32 -> vector<2x128xf32>
    %cst_53 = arith.constant -1.000000e+30 : f32
    %132 = vector.broadcast %cst_53 : f32 to vector<2x128xf32>
    %133 = arith.select %104, %131, %132 : vector<2x128xi1>, vector<2x128xf32>
    %c2_i32_54 = arith.constant 2 : i32
    %134 = tpu.dynamic_rotate %128 by %c2_i32_54 dim 1 : vector<2x128xf32>, i32 -> vector<2x128xf32>
    %cst_55 = arith.constant -1.000000e+30 : f32
    %135 = vector.broadcast %cst_55 : f32 to vector<2x128xf32>
    %136 = arith.select %112, %134, %135 : vector<2x128xi1>, vector<2x128xf32>
    %137 = arith.maximumf %128, %133 : vector<2x128xf32>
    %138 = arith.maximumf %137, %136 : vector<2x128xf32>
    %139 = arith.subf %128, %138 : vector<2x128xf32>
    %140 = math.exp %139 : vector<2x128xf32>
    %141 = arith.subf %133, %138 : vector<2x128xf32>
    %142 = math.exp %141 : vector<2x128xf32>
    %143 = arith.addf %140, %142 : vector<2x128xf32>
    %144 = arith.subf %136, %138 : vector<2x128xf32>
    %145 = math.exp %144 : vector<2x128xf32>
    %146 = arith.addf %143, %145 : vector<2x128xf32>
    %147 = math.log %146 : vector<2x128xf32>
    %148 = arith.addf %138, %147 : vector<2x128xf32>
    %149 = arith.addf %148, %130 : vector<2x128xf32>
    %c2_56 = arith.constant 2 : index
    %c0_57 = arith.constant 0 : index
    %c0_58 = arith.constant 0 : index
    %150 = vector.load %arg5[%c2_56, %c0_57, %c0_58] : memref<16x2x128xf32, #tpu.memory_space<vmem>>, vector<1x2x128xf32>
    %151 = vector.shape_cast %150 : vector<1x2x128xf32> to vector<2x128xf32>
    %c1_i32_59 = arith.constant 1 : i32
    %152 = tpu.dynamic_rotate %149 by %c1_i32_59 dim 1 : vector<2x128xf32>, i32 -> vector<2x128xf32>
    %cst_60 = arith.constant -1.000000e+30 : f32
    %153 = vector.broadcast %cst_60 : f32 to vector<2x128xf32>
    %154 = arith.select %104, %152, %153 : vector<2x128xi1>, vector<2x128xf32>
    %c2_i32_61 = arith.constant 2 : i32
    %155 = tpu.dynamic_rotate %149 by %c2_i32_61 dim 1 : vector<2x128xf32>, i32 -> vector<2x128xf32>
    %cst_62 = arith.constant -1.000000e+30 : f32
    %156 = vector.broadcast %cst_62 : f32 to vector<2x128xf32>
    %157 = arith.select %112, %155, %156 : vector<2x128xi1>, vector<2x128xf32>
    %158 = arith.maximumf %149, %154 : vector<2x128xf32>
    %159 = arith.maximumf %158, %157 : vector<2x128xf32>
    %160 = arith.subf %149, %159 : vector<2x128xf32>
    %161 = math.exp %160 : vector<2x128xf32>
    %162 = arith.subf %154, %159 : vector<2x128xf32>
    %163 = math.exp %162 : vector<2x128xf32>
    %164 = arith.addf %161, %163 : vector<2x128xf32>
    %165 = arith.subf %157, %159 : vector<2x128xf32>
    %166 = math.exp %165 : vector<2x128xf32>
    %167 = arith.addf %164, %166 : vector<2x128xf32>
    %168 = math.log %167 : vector<2x128xf32>
    %169 = arith.addf %159, %168 : vector<2x128xf32>
    %170 = arith.addf %169, %151 : vector<2x128xf32>
    %c3_63 = arith.constant 3 : index
    %c0_64 = arith.constant 0 : index
    %c0_65 = arith.constant 0 : index
    %171 = vector.load %arg5[%c3_63, %c0_64, %c0_65] : memref<16x2x128xf32, #tpu.memory_space<vmem>>, vector<1x2x128xf32>
    %172 = vector.shape_cast %171 : vector<1x2x128xf32> to vector<2x128xf32>
    %c1_i32_66 = arith.constant 1 : i32
    %173 = tpu.dynamic_rotate %170 by %c1_i32_66 dim 1 : vector<2x128xf32>, i32 -> vector<2x128xf32>
    %cst_67 = arith.constant -1.000000e+30 : f32
    %174 = vector.broadcast %cst_67 : f32 to vector<2x128xf32>
    %175 = arith.select %104, %173, %174 : vector<2x128xi1>, vector<2x128xf32>
    %c2_i32_68 = arith.constant 2 : i32
    %176 = tpu.dynamic_rotate %170 by %c2_i32_68 dim 1 : vector<2x128xf32>, i32 -> vector<2x128xf32>
    %cst_69 = arith.constant -1.000000e+30 : f32
    %177 = vector.broadcast %cst_69 : f32 to vector<2x128xf32>
    %178 = arith.select %112, %176, %177 : vector<2x128xi1>, vector<2x128xf32>
    %179 = arith.maximumf %170, %175 : vector<2x128xf32>
    %180 = arith.maximumf %179, %178 : vector<2x128xf32>
    %181 = arith.subf %170, %180 : vector<2x128xf32>
    %182 = math.exp %181 : vector<2x128xf32>
    %183 = arith.subf %175, %180 : vector<2x128xf32>
    %184 = math.exp %183 : vector<2x128xf32>
    %185 = arith.addf %182, %184 : vector<2x128xf32>
    %186 = arith.subf %178, %180 : vector<2x128xf32>
    %187 = math.exp %186 : vector<2x128xf32>
    %188 = arith.addf %185, %187 : vector<2x128xf32>
    %189 = math.log %188 : vector<2x128xf32>
    %190 = arith.addf %180, %189 : vector<2x128xf32>
    %191 = arith.addf %190, %172 : vector<2x128xf32>
    %c4_70 = arith.constant 4 : index
    %c0_71 = arith.constant 0 : index
    %c0_72 = arith.constant 0 : index
    %192 = vector.load %arg5[%c4_70, %c0_71, %c0_72] : memref<16x2x128xf32, #tpu.memory_space<vmem>>, vector<1x2x128xf32>
    %193 = vector.shape_cast %192 : vector<1x2x128xf32> to vector<2x128xf32>
    %c1_i32_73 = arith.constant 1 : i32
    %194 = tpu.dynamic_rotate %191 by %c1_i32_73 dim 1 : vector<2x128xf32>, i32 -> vector<2x128xf32>
    %cst_74 = arith.constant -1.000000e+30 : f32
    %195 = vector.broadcast %cst_74 : f32 to vector<2x128xf32>
    %196 = arith.select %104, %194, %195 : vector<2x128xi1>, vector<2x128xf32>
    %c2_i32_75 = arith.constant 2 : i32
    %197 = tpu.dynamic_rotate %191 by %c2_i32_75 dim 1 : vector<2x128xf32>, i32 -> vector<2x128xf32>
    %cst_76 = arith.constant -1.000000e+30 : f32
    %198 = vector.broadcast %cst_76 : f32 to vector<2x128xf32>
    %199 = arith.select %112, %197, %198 : vector<2x128xi1>, vector<2x128xf32>
    %200 = arith.maximumf %191, %196 : vector<2x128xf32>
    %201 = arith.maximumf %200, %199 : vector<2x128xf32>
    %202 = arith.subf %191, %201 : vector<2x128xf32>
    %203 = math.exp %202 : vector<2x128xf32>
    %204 = arith.subf %196, %201 : vector<2x128xf32>
    %205 = math.exp %204 : vector<2x128xf32>
    %206 = arith.addf %203, %205 : vector<2x128xf32>
    %207 = arith.subf %199, %201 : vector<2x128xf32>
    %208 = math.exp %207 : vector<2x128xf32>
    %209 = arith.addf %206, %208 : vector<2x128xf32>
    %210 = math.log %209 : vector<2x128xf32>
    %211 = arith.addf %201, %210 : vector<2x128xf32>
    %212 = arith.addf %211, %193 : vector<2x128xf32>
    %c5_77 = arith.constant 5 : index
    %c0_78 = arith.constant 0 : index
    %c0_79 = arith.constant 0 : index
    %213 = vector.load %arg5[%c5_77, %c0_78, %c0_79] : memref<16x2x128xf32, #tpu.memory_space<vmem>>, vector<1x2x128xf32>
    %214 = vector.shape_cast %213 : vector<1x2x128xf32> to vector<2x128xf32>
    %c1_i32_80 = arith.constant 1 : i32
    %215 = tpu.dynamic_rotate %212 by %c1_i32_80 dim 1 : vector<2x128xf32>, i32 -> vector<2x128xf32>
    %cst_81 = arith.constant -1.000000e+30 : f32
    %216 = vector.broadcast %cst_81 : f32 to vector<2x128xf32>
    %217 = arith.select %104, %215, %216 : vector<2x128xi1>, vector<2x128xf32>
    %c2_i32_82 = arith.constant 2 : i32
    %218 = tpu.dynamic_rotate %212 by %c2_i32_82 dim 1 : vector<2x128xf32>, i32 -> vector<2x128xf32>
    %cst_83 = arith.constant -1.000000e+30 : f32
    %219 = vector.broadcast %cst_83 : f32 to vector<2x128xf32>
    %220 = arith.select %112, %218, %219 : vector<2x128xi1>, vector<2x128xf32>
    %221 = arith.maximumf %212, %217 : vector<2x128xf32>
    %222 = arith.maximumf %221, %220 : vector<2x128xf32>
    %223 = arith.subf %212, %222 : vector<2x128xf32>
    %224 = math.exp %223 : vector<2x128xf32>
    %225 = arith.subf %217, %222 : vector<2x128xf32>
    %226 = math.exp %225 : vector<2x128xf32>
    %227 = arith.addf %224, %226 : vector<2x128xf32>
    %228 = arith.subf %220, %222 : vector<2x128xf32>
    %229 = math.exp %228 : vector<2x128xf32>
    %230 = arith.addf %227, %229 : vector<2x128xf32>
    %231 = math.log %230 : vector<2x128xf32>
    %232 = arith.addf %222, %231 : vector<2x128xf32>
    %233 = arith.addf %232, %214 : vector<2x128xf32>
    %c6_84 = arith.constant 6 : index
    %c0_85 = arith.constant 0 : index
    %c0_86 = arith.constant 0 : index
    %234 = vector.load %arg5[%c6_84, %c0_85, %c0_86] : memref<16x2x128xf32, #tpu.memory_space<vmem>>, vector<1x2x128xf32>
    %235 = vector.shape_cast %234 : vector<1x2x128xf32> to vector<2x128xf32>
    %c1_i32_87 = arith.constant 1 : i32
    %236 = tpu.dynamic_rotate %233 by %c1_i32_87 dim 1 : vector<2x128xf32>, i32 -> vector<2x128xf32>
    %cst_88 = arith.constant -1.000000e+30 : f32
    %237 = vector.broadcast %cst_88 : f32 to vector<2x128xf32>
    %238 = arith.select %104, %236, %237 : vector<2x128xi1>, vector<2x128xf32>
    %c2_i32_89 = arith.constant 2 : i32
    %239 = tpu.dynamic_rotate %233 by %c2_i32_89 dim 1 : vector<2x128xf32>, i32 -> vector<2x128xf32>
    %cst_90 = arith.constant -1.000000e+30 : f32
    %240 = vector.broadcast %cst_90 : f32 to vector<2x128xf32>
    %241 = arith.select %112, %239, %240 : vector<2x128xi1>, vector<2x128xf32>
    %242 = arith.maximumf %233, %238 : vector<2x128xf32>
    %243 = arith.maximumf %242, %241 : vector<2x128xf32>
    %244 = arith.subf %233, %243 : vector<2x128xf32>
    %245 = math.exp %244 : vector<2x128xf32>
    %246 = arith.subf %238, %243 : vector<2x128xf32>
    %247 = math.exp %246 : vector<2x128xf32>
    %248 = arith.addf %245, %247 : vector<2x128xf32>
    %249 = arith.subf %241, %243 : vector<2x128xf32>
    %250 = math.exp %249 : vector<2x128xf32>
    %251 = arith.addf %248, %250 : vector<2x128xf32>
    %252 = math.log %251 : vector<2x128xf32>
    %253 = arith.addf %243, %252 : vector<2x128xf32>
    %254 = arith.addf %253, %235 : vector<2x128xf32>
    %c7_91 = arith.constant 7 : index
    %c0_92 = arith.constant 0 : index
    %c0_93 = arith.constant 0 : index
    %255 = vector.load %arg5[%c7_91, %c0_92, %c0_93] : memref<16x2x128xf32, #tpu.memory_space<vmem>>, vector<1x2x128xf32>
    %256 = vector.shape_cast %255 : vector<1x2x128xf32> to vector<2x128xf32>
    %c1_i32_94 = arith.constant 1 : i32
    %257 = tpu.dynamic_rotate %254 by %c1_i32_94 dim 1 : vector<2x128xf32>, i32 -> vector<2x128xf32>
    %cst_95 = arith.constant -1.000000e+30 : f32
    %258 = vector.broadcast %cst_95 : f32 to vector<2x128xf32>
    %259 = arith.select %104, %257, %258 : vector<2x128xi1>, vector<2x128xf32>
    %c2_i32_96 = arith.constant 2 : i32
    %260 = tpu.dynamic_rotate %254 by %c2_i32_96 dim 1 : vector<2x128xf32>, i32 -> vector<2x128xf32>
    %cst_97 = arith.constant -1.000000e+30 : f32
    %261 = vector.broadcast %cst_97 : f32 to vector<2x128xf32>
    %262 = arith.select %112, %260, %261 : vector<2x128xi1>, vector<2x128xf32>
    %263 = arith.maximumf %254, %259 : vector<2x128xf32>
    %264 = arith.maximumf %263, %262 : vector<2x128xf32>
    %265 = arith.subf %254, %264 : vector<2x128xf32>
    %266 = math.exp %265 : vector<2x128xf32>
    %267 = arith.subf %259, %264 : vector<2x128xf32>
    %268 = math.exp %267 : vector<2x128xf32>
    %269 = arith.addf %266, %268 : vector<2x128xf32>
    %270 = arith.subf %262, %264 : vector<2x128xf32>
    %271 = math.exp %270 : vector<2x128xf32>
    %272 = arith.addf %269, %271 : vector<2x128xf32>
    %273 = math.log %272 : vector<2x128xf32>
    %274 = arith.addf %264, %273 : vector<2x128xf32>
    %275 = arith.addf %274, %256 : vector<2x128xf32>
    %c8_98 = arith.constant 8 : index
    %c0_99 = arith.constant 0 : index
    %c0_100 = arith.constant 0 : index
    %276 = vector.load %arg5[%c8_98, %c0_99, %c0_100] : memref<16x2x128xf32, #tpu.memory_space<vmem>>, vector<1x2x128xf32>
    %277 = vector.shape_cast %276 : vector<1x2x128xf32> to vector<2x128xf32>
    %c1_i32_101 = arith.constant 1 : i32
    %278 = tpu.dynamic_rotate %275 by %c1_i32_101 dim 1 : vector<2x128xf32>, i32 -> vector<2x128xf32>
    %cst_102 = arith.constant -1.000000e+30 : f32
    %279 = vector.broadcast %cst_102 : f32 to vector<2x128xf32>
    %280 = arith.select %104, %278, %279 : vector<2x128xi1>, vector<2x128xf32>
    %c2_i32_103 = arith.constant 2 : i32
    %281 = tpu.dynamic_rotate %275 by %c2_i32_103 dim 1 : vector<2x128xf32>, i32 -> vector<2x128xf32>
    %cst_104 = arith.constant -1.000000e+30 : f32
    %282 = vector.broadcast %cst_104 : f32 to vector<2x128xf32>
    %283 = arith.select %112, %281, %282 : vector<2x128xi1>, vector<2x128xf32>
    %284 = arith.maximumf %275, %280 : vector<2x128xf32>
    %285 = arith.maximumf %284, %283 : vector<2x128xf32>
    %286 = arith.subf %275, %285 : vector<2x128xf32>
    %287 = math.exp %286 : vector<2x128xf32>
    %288 = arith.subf %280, %285 : vector<2x128xf32>
    %289 = math.exp %288 : vector<2x128xf32>
    %290 = arith.addf %287, %289 : vector<2x128xf32>
    %291 = arith.subf %283, %285 : vector<2x128xf32>
    %292 = math.exp %291 : vector<2x128xf32>
    %293 = arith.addf %290, %292 : vector<2x128xf32>
    %294 = math.log %293 : vector<2x128xf32>
    %295 = arith.addf %285, %294 : vector<2x128xf32>
    %296 = arith.addf %295, %277 : vector<2x128xf32>
    %c9_105 = arith.constant 9 : index
    %c0_106 = arith.constant 0 : index
    %c0_107 = arith.constant 0 : index
    %297 = vector.load %arg5[%c9_105, %c0_106, %c0_107] : memref<16x2x128xf32, #tpu.memory_space<vmem>>, vector<1x2x128xf32>
    %298 = vector.shape_cast %297 : vector<1x2x128xf32> to vector<2x128xf32>
    %c1_i32_108 = arith.constant 1 : i32
    %299 = tpu.dynamic_rotate %296 by %c1_i32_108 dim 1 : vector<2x128xf32>, i32 -> vector<2x128xf32>
    %cst_109 = arith.constant -1.000000e+30 : f32
    %300 = vector.broadcast %cst_109 : f32 to vector<2x128xf32>
    %301 = arith.select %104, %299, %300 : vector<2x128xi1>, vector<2x128xf32>
    %c2_i32_110 = arith.constant 2 : i32
    %302 = tpu.dynamic_rotate %296 by %c2_i32_110 dim 1 : vector<2x128xf32>, i32 -> vector<2x128xf32>
    %cst_111 = arith.constant -1.000000e+30 : f32
    %303 = vector.broadcast %cst_111 : f32 to vector<2x128xf32>
    %304 = arith.select %112, %302, %303 : vector<2x128xi1>, vector<2x128xf32>
    %305 = arith.maximumf %296, %301 : vector<2x128xf32>
    %306 = arith.maximumf %305, %304 : vector<2x128xf32>
    %307 = arith.subf %296, %306 : vector<2x128xf32>
    %308 = math.exp %307 : vector<2x128xf32>
    %309 = arith.subf %301, %306 : vector<2x128xf32>
    %310 = math.exp %309 : vector<2x128xf32>
    %311 = arith.addf %308, %310 : vector<2x128xf32>
    %312 = arith.subf %304, %306 : vector<2x128xf32>
    %313 = math.exp %312 : vector<2x128xf32>
    %314 = arith.addf %311, %313 : vector<2x128xf32>
    %315 = math.log %314 : vector<2x128xf32>
    %316 = arith.addf %306, %315 : vector<2x128xf32>
    %317 = arith.addf %316, %298 : vector<2x128xf32>
    %c10_112 = arith.constant 10 : index
    %c0_113 = arith.constant 0 : index
    %c0_114 = arith.constant 0 : index
    %318 = vector.load %arg5[%c10_112, %c0_113, %c0_114] : memref<16x2x128xf32, #tpu.memory_space<vmem>>, vector<1x2x128xf32>
    %319 = vector.shape_cast %318 : vector<1x2x128xf32> to vector<2x128xf32>
    %c1_i32_115 = arith.constant 1 : i32
    %320 = tpu.dynamic_rotate %317 by %c1_i32_115 dim 1 : vector<2x128xf32>, i32 -> vector<2x128xf32>
    %cst_116 = arith.constant -1.000000e+30 : f32
    %321 = vector.broadcast %cst_116 : f32 to vector<2x128xf32>
    %322 = arith.select %104, %320, %321 : vector<2x128xi1>, vector<2x128xf32>
    %c2_i32_117 = arith.constant 2 : i32
    %323 = tpu.dynamic_rotate %317 by %c2_i32_117 dim 1 : vector<2x128xf32>, i32 -> vector<2x128xf32>
    %cst_118 = arith.constant -1.000000e+30 : f32
    %324 = vector.broadcast %cst_118 : f32 to vector<2x128xf32>
    %325 = arith.select %112, %323, %324 : vector<2x128xi1>, vector<2x128xf32>
    %326 = arith.maximumf %317, %322 : vector<2x128xf32>
    %327 = arith.maximumf %326, %325 : vector<2x128xf32>
    %328 = arith.subf %317, %327 : vector<2x128xf32>
    %329 = math.exp %328 : vector<2x128xf32>
    %330 = arith.subf %322, %327 : vector<2x128xf32>
    %331 = math.exp %330 : vector<2x128xf32>
    %332 = arith.addf %329, %331 : vector<2x128xf32>
    %333 = arith.subf %325, %327 : vector<2x128xf32>
    %334 = math.exp %333 : vector<2x128xf32>
    %335 = arith.addf %332, %334 : vector<2x128xf32>
    %336 = math.log %335 : vector<2x128xf32>
    %337 = arith.addf %327, %336 : vector<2x128xf32>
    %338 = arith.addf %337, %319 : vector<2x128xf32>
    %c11_119 = arith.constant 11 : index
    %c0_120 = arith.constant 0 : index
    %c0_121 = arith.constant 0 : index
    %339 = vector.load %arg5[%c11_119, %c0_120, %c0_121] : memref<16x2x128xf32, #tpu.memory_space<vmem>>, vector<1x2x128xf32>
    %340 = vector.shape_cast %339 : vector<1x2x128xf32> to vector<2x128xf32>
    %c1_i32_122 = arith.constant 1 : i32
    %341 = tpu.dynamic_rotate %338 by %c1_i32_122 dim 1 : vector<2x128xf32>, i32 -> vector<2x128xf32>
    %cst_123 = arith.constant -1.000000e+30 : f32
    %342 = vector.broadcast %cst_123 : f32 to vector<2x128xf32>
    %343 = arith.select %104, %341, %342 : vector<2x128xi1>, vector<2x128xf32>
    %c2_i32_124 = arith.constant 2 : i32
    %344 = tpu.dynamic_rotate %338 by %c2_i32_124 dim 1 : vector<2x128xf32>, i32 -> vector<2x128xf32>
    %cst_125 = arith.constant -1.000000e+30 : f32
    %345 = vector.broadcast %cst_125 : f32 to vector<2x128xf32>
    %346 = arith.select %112, %344, %345 : vector<2x128xi1>, vector<2x128xf32>
    %347 = arith.maximumf %338, %343 : vector<2x128xf32>
    %348 = arith.maximumf %347, %346 : vector<2x128xf32>
    %349 = arith.subf %338, %348 : vector<2x128xf32>
    %350 = math.exp %349 : vector<2x128xf32>
    %351 = arith.subf %343, %348 : vector<2x128xf32>
    %352 = math.exp %351 : vector<2x128xf32>
    %353 = arith.addf %350, %352 : vector<2x128xf32>
    %354 = arith.subf %346, %348 : vector<2x128xf32>
    %355 = math.exp %354 : vector<2x128xf32>
    %356 = arith.addf %353, %355 : vector<2x128xf32>
    %357 = math.log %356 : vector<2x128xf32>
    %358 = arith.addf %348, %357 : vector<2x128xf32>
    %359 = arith.addf %358, %340 : vector<2x128xf32>
    %c12_126 = arith.constant 12 : index
    %c0_127 = arith.constant 0 : index
    %c0_128 = arith.constant 0 : index
    %360 = vector.load %arg5[%c12_126, %c0_127, %c0_128] : memref<16x2x128xf32, #tpu.memory_space<vmem>>, vector<1x2x128xf32>
    %361 = vector.shape_cast %360 : vector<1x2x128xf32> to vector<2x128xf32>
    %c1_i32_129 = arith.constant 1 : i32
    %362 = tpu.dynamic_rotate %359 by %c1_i32_129 dim 1 : vector<2x128xf32>, i32 -> vector<2x128xf32>
    %cst_130 = arith.constant -1.000000e+30 : f32
    %363 = vector.broadcast %cst_130 : f32 to vector<2x128xf32>
    %364 = arith.select %104, %362, %363 : vector<2x128xi1>, vector<2x128xf32>
    %c2_i32_131 = arith.constant 2 : i32
    %365 = tpu.dynamic_rotate %359 by %c2_i32_131 dim 1 : vector<2x128xf32>, i32 -> vector<2x128xf32>
    %cst_132 = arith.constant -1.000000e+30 : f32
    %366 = vector.broadcast %cst_132 : f32 to vector<2x128xf32>
    %367 = arith.select %112, %365, %366 : vector<2x128xi1>, vector<2x128xf32>
    %368 = arith.maximumf %359, %364 : vector<2x128xf32>
    %369 = arith.maximumf %368, %367 : vector<2x128xf32>
    %370 = arith.subf %359, %369 : vector<2x128xf32>
    %371 = math.exp %370 : vector<2x128xf32>
    %372 = arith.subf %364, %369 : vector<2x128xf32>
    %373 = math.exp %372 : vector<2x128xf32>
    %374 = arith.addf %371, %373 : vector<2x128xf32>
    %375 = arith.subf %367, %369 : vector<2x128xf32>
    %376 = math.exp %375 : vector<2x128xf32>
    %377 = arith.addf %374, %376 : vector<2x128xf32>
    %378 = math.log %377 : vector<2x128xf32>
    %379 = arith.addf %369, %378 : vector<2x128xf32>
    %380 = arith.addf %379, %361 : vector<2x128xf32>
    %c13_133 = arith.constant 13 : index
    %c0_134 = arith.constant 0 : index
    %c0_135 = arith.constant 0 : index
    %381 = vector.load %arg5[%c13_133, %c0_134, %c0_135] : memref<16x2x128xf32, #tpu.memory_space<vmem>>, vector<1x2x128xf32>
    %382 = vector.shape_cast %381 : vector<1x2x128xf32> to vector<2x128xf32>
    %c1_i32_136 = arith.constant 1 : i32
    %383 = tpu.dynamic_rotate %380 by %c1_i32_136 dim 1 : vector<2x128xf32>, i32 -> vector<2x128xf32>
    %cst_137 = arith.constant -1.000000e+30 : f32
    %384 = vector.broadcast %cst_137 : f32 to vector<2x128xf32>
    %385 = arith.select %104, %383, %384 : vector<2x128xi1>, vector<2x128xf32>
    %c2_i32_138 = arith.constant 2 : i32
    %386 = tpu.dynamic_rotate %380 by %c2_i32_138 dim 1 : vector<2x128xf32>, i32 -> vector<2x128xf32>
    %cst_139 = arith.constant -1.000000e+30 : f32
    %387 = vector.broadcast %cst_139 : f32 to vector<2x128xf32>
    %388 = arith.select %112, %386, %387 : vector<2x128xi1>, vector<2x128xf32>
    %389 = arith.maximumf %380, %385 : vector<2x128xf32>
    %390 = arith.maximumf %389, %388 : vector<2x128xf32>
    %391 = arith.subf %380, %390 : vector<2x128xf32>
    %392 = math.exp %391 : vector<2x128xf32>
    %393 = arith.subf %385, %390 : vector<2x128xf32>
    %394 = math.exp %393 : vector<2x128xf32>
    %395 = arith.addf %392, %394 : vector<2x128xf32>
    %396 = arith.subf %388, %390 : vector<2x128xf32>
    %397 = math.exp %396 : vector<2x128xf32>
    %398 = arith.addf %395, %397 : vector<2x128xf32>
    %399 = math.log %398 : vector<2x128xf32>
    %400 = arith.addf %390, %399 : vector<2x128xf32>
    %401 = arith.addf %400, %382 : vector<2x128xf32>
    %c14_140 = arith.constant 14 : index
    %c0_141 = arith.constant 0 : index
    %c0_142 = arith.constant 0 : index
    %402 = vector.load %arg5[%c14_140, %c0_141, %c0_142] : memref<16x2x128xf32, #tpu.memory_space<vmem>>, vector<1x2x128xf32>
    %403 = vector.shape_cast %402 : vector<1x2x128xf32> to vector<2x128xf32>
    %c1_i32_143 = arith.constant 1 : i32
    %404 = tpu.dynamic_rotate %401 by %c1_i32_143 dim 1 : vector<2x128xf32>, i32 -> vector<2x128xf32>
    %cst_144 = arith.constant -1.000000e+30 : f32
    %405 = vector.broadcast %cst_144 : f32 to vector<2x128xf32>
    %406 = arith.select %104, %404, %405 : vector<2x128xi1>, vector<2x128xf32>
    %c2_i32_145 = arith.constant 2 : i32
    %407 = tpu.dynamic_rotate %401 by %c2_i32_145 dim 1 : vector<2x128xf32>, i32 -> vector<2x128xf32>
    %cst_146 = arith.constant -1.000000e+30 : f32
    %408 = vector.broadcast %cst_146 : f32 to vector<2x128xf32>
    %409 = arith.select %112, %407, %408 : vector<2x128xi1>, vector<2x128xf32>
    %410 = arith.maximumf %401, %406 : vector<2x128xf32>
    %411 = arith.maximumf %410, %409 : vector<2x128xf32>
    %412 = arith.subf %401, %411 : vector<2x128xf32>
    %413 = math.exp %412 : vector<2x128xf32>
    %414 = arith.subf %406, %411 : vector<2x128xf32>
    %415 = math.exp %414 : vector<2x128xf32>
    %416 = arith.addf %413, %415 : vector<2x128xf32>
    %417 = arith.subf %409, %411 : vector<2x128xf32>
    %418 = math.exp %417 : vector<2x128xf32>
    %419 = arith.addf %416, %418 : vector<2x128xf32>
    %420 = math.log %419 : vector<2x128xf32>
    %421 = arith.addf %411, %420 : vector<2x128xf32>
    %422 = arith.addf %421, %403 : vector<2x128xf32>
    %c15_147 = arith.constant 15 : index
    %c0_148 = arith.constant 0 : index
    %c0_149 = arith.constant 0 : index
    %423 = vector.load %arg5[%c15_147, %c0_148, %c0_149] : memref<16x2x128xf32, #tpu.memory_space<vmem>>, vector<1x2x128xf32>
    %424 = vector.shape_cast %423 : vector<1x2x128xf32> to vector<2x128xf32>
    %c1_i32_150 = arith.constant 1 : i32
    %425 = tpu.dynamic_rotate %422 by %c1_i32_150 dim 1 : vector<2x128xf32>, i32 -> vector<2x128xf32>
    %cst_151 = arith.constant -1.000000e+30 : f32
    %426 = vector.broadcast %cst_151 : f32 to vector<2x128xf32>
    %427 = arith.select %104, %425, %426 : vector<2x128xi1>, vector<2x128xf32>
    %c2_i32_152 = arith.constant 2 : i32
    %428 = tpu.dynamic_rotate %422 by %c2_i32_152 dim 1 : vector<2x128xf32>, i32 -> vector<2x128xf32>
    %cst_153 = arith.constant -1.000000e+30 : f32
    %429 = vector.broadcast %cst_153 : f32 to vector<2x128xf32>
    %430 = arith.select %112, %428, %429 : vector<2x128xi1>, vector<2x128xf32>
    %431 = arith.maximumf %422, %427 : vector<2x128xf32>
    %432 = arith.maximumf %431, %430 : vector<2x128xf32>
    %433 = arith.subf %422, %432 : vector<2x128xf32>
    %434 = math.exp %433 : vector<2x128xf32>
    %435 = arith.subf %427, %432 : vector<2x128xf32>
    %436 = math.exp %435 : vector<2x128xf32>
    %437 = arith.addf %434, %436 : vector<2x128xf32>
    %438 = arith.subf %430, %432 : vector<2x128xf32>
    %439 = math.exp %438 : vector<2x128xf32>
    %440 = arith.addf %437, %439 : vector<2x128xf32>
    %441 = math.log %440 : vector<2x128xf32>
    %442 = arith.addf %432, %441 : vector<2x128xf32>
    %443 = arith.addf %442, %424 : vector<2x128xf32>
    %cst_154 = arith.constant -1.000000e+30 : f32
    %444 = vector.broadcast %cst_154 : f32 to vector<2x128xf32>
    %445 = arith.select %122, %443, %444 : vector<2x128xi1>, vector<2x128xf32>
    %cst_155 = arith.constant dense<0xFF800000> : vector<2xf32>
    %446 = vector.multi_reduction <maximumf>, %445, %cst_155 [1] : vector<2x128xf32> to vector<2xf32>
    %447 = vector.shape_cast %446 : vector<2xf32> to vector<2x1xf32>
    %448 = vector.broadcast %447 : vector<2x1xf32> to vector<2x128xf32>
    %449 = arith.subf %445, %448 : vector<2x128xf32>
    %450 = math.exp %449 : vector<2x128xf32>
    %cst_156 = arith.constant dense<0.000000e+00> : vector<2xf32>
    %451 = vector.multi_reduction <add>, %450, %cst_156 [1] : vector<2x128xf32> to vector<2xf32>
    %452 = vector.shape_cast %451 : vector<2xf32> to vector<2x1xf32>
    %453 = math.log %452 : vector<2x1xf32>
    %454 = arith.addf %447, %453 : vector<2x1xf32>
    %cst_157 = arith.constant 0.000000e+00 : f32
    %455 = vector.broadcast %cst_157 : f32 to vector<2x1xf32>
    %456 = arith.subf %455, %454 : vector<2x1xf32>
    %457 = vector.shape_cast %456 : vector<2x1xf32> to vector<2x1xf32>
    %458 = vector.broadcast %457 : vector<2x1xf32> to vector<2x128xf32>
    %c0_158 = arith.constant 0 : index
    %c0_159 = arith.constant 0 : index
    %459 = vector.load %arg4[%c0_158, %c0_159] : memref<2x128xf32, #tpu.memory_space<vmem>>, vector<2x128xf32>
    tpu.vector_store %arg4[%c0_158, %c0_159], %458 {strides = array<i32>} : memref<2x128xf32, #tpu.memory_space<vmem>>, vector<2x128xf32>,
    return
  }
  func.func @transform_0(%arg0: i32) -> (i32, i32, i32) {
    %c0_i32 = arith.constant 0 : i32
    %c0_i32_0 = arith.constant 0 : i32
    %c0_i32_1 = arith.constant 0 : i32
    return %arg0, %c0_i32, %c0_i32_0 : i32, i32, i32
  }
  func.func @transform_1(%arg0: i32) -> (i32, i32) {
    %c0_i32 = arith.constant 0 : i32
    %c0_i32_0 = arith.constant 0 : i32
    return %arg0, %c0_i32 : i32, i32
  }
  func.func @transform_2(%arg0: i32) -> (i32, i32) {
    %c0_i32 = arith.constant 0 : i32
    %c0_i32_0 = arith.constant 0 : i32
    return %arg0, %c0_i32 : i32, i32
  }
  func.func @transform_3(%arg0: i32) -> (i32, i32) {
    %c0_i32 = arith.constant 0 : i32
    %c0_i32_0 = arith.constant 0 : i32
    return %arg0, %c0_i32 : i32, i32
  }
}

</mosaic_0001>

<bundles_post_ra>
// kernel: _lambda_.3
= control target key start
LH: loop header
LB: loop body
LE: loop exit
PB: predicated region body
PF: predicated region fallthrough
CT: control target
= control target key end

     0   :  { %s326_s9 = smov 0   ;;  %s353_s0 = inlined_call_operand.vmem [shape: f32[2,9,96], index: 0, kind: input, shape index: {}]   ;;  %s354_s1 = inlined_call_operand.vmem [shape: s32[2,9,1], index: 1, kind: input, shape index: {}]   ;;  %s355_s2 = inlined_call_operand.vmem [shape: f32[2,8,128], index: 2, kind: output, shape index: {}]  }
   0x1 LB: > { %s269_s10 = sadd.s32 4294967295, %s307_s9   ;;  %p273_p0 = scmp.ge.s32.totalorder %s307_s9, 1  ;;  %s307_s9 = sphi %s326_s9, %s12_s9  }
   0x2   : > { %p122_p1 = scmp.lt.s32.totalorder %s307_s9, 3 }
   0x4   : > { %p123_p2 = pnand %p273_p0, %p122_p1 }
   0x5   : > { %p148_p3 = scmp.lt.s32.totalorder (!%p123_p2), %s269_s10, 1  ;;  %v309_v0 = vmov (!%p123_p2), 0   ;;  %vm164_vm0 = vcmask (!%p123_p2), 785408   ;;  %v176_v7 = vlaneseq (!%p123_p2)  ;;  %v310_v18 = vmov (!%p123_p2), 0.0  }
   0x6   : > { %126 = sbr.rel (%p123_p2) target bundleno = 542 (0x21e), region = 28  ;;  %296 = vset.pattern.permute.xlu0 (!%p123_p2), %v309_v0  ;;  %vm191_vm3 = vcmask (!%p123_p2), 7168  }
   0x7   : > { %v177_v8 = vand.u32 (!%p123_p2), 127, %v176_v7 }
   0xd   : > { %s357_s10 = smov (!%p148_p3, %s269_s10), 1 }
   0xe   : > { %s282_s11 = sshll.u32 %s357_s10, 4  ;;  %s278_s18 = sshll.u32 %s357_s10, 3 }
   0xf   : > { %s152_s14 = scalar_lea.vmem %s353_s0, %s282_s11  ;;  %s157_s17 = scalar_lea.vmem %s354_s1, %s282_s11 }
  0x10   : > { %v162_v1 = vld [vmem:[%s152_s14] sm:$0xff]  ;;  %s161_s21 = scalar_lea.vmem %s355_s2, %s278_s18 }
  0x11   : > { %v165_v2 = vsel %vm164_vm0, %v162_v1, -inf  ;;  %v163_v3 = vld [vmem:[%s157_s17 + $0x1] sm:$0xff] }
  0x12   : > { %166 = vmax.xlane.f32.xlu0 %v165_v2  ;;  %vm187_vm2 = vcmp.ne.s32.totalorder %v163_v3, 92 }
  0x13   : > { %v279_v19 = vsel %vm187_vm2, 1.0, %v310_v18 }
  0x28   : > { %179 = vperm.xlu0 %296, %v163_v3  }
  0x9f   : > { %v167_v4 = vpop.xlane.xlu0 %166 }
  0xa0   : > { %v168_v5 = vsub.f32 %v162_v1, %v167_v4 }
  0xa2   : > { %v169_v6 = vmul.f32 1.442695, %v168_v5 }
  0xa4   : > { %297 = vpow2.f32 %v169_v6 }
  0xa7   : > { %v180_v9 = vpop.permute.xlu0 %179 }
  0xa8   : > { %vm181_vm1 = vcmp.eq.s32.totalorder %v177_v8, %v180_v9 }
  0xa9   : > { %v182_v12 = vsel %vm181_vm1, %v168_v5, 0.0 }
  0xaa   : > { %v183_v13 = vsel %vm164_vm0, %v182_v12, 0.0 }
  0xae   : > { %v298_v10 = vpop.eup %297 }
  0xaf   : > { %v171_v11 = vsel %vm164_vm0, %v298_v10, 0.0 }
  0xb0   : > { %172 = vadd.xlane.f32.xlu1 %v171_v11 }
  0xb4   : > { %184 = vadd.xlane.f32.xlu1 %v183_v13 }
 0x13d   : > { %v173_v14 = vpop.xlane.xlu1 %172 }
 0x13e   : > { %299 = vlog2.f32 %v173_v14 }
 0x141   : > { %v185_v17 = vpop.xlane.xlu1 %184 }
 0x148   : > { %v300_v15 = vpop.eup %299 }
 0x149   : > { %v175_v16 = vmul.f32 0.6931472, %v300_v15 }
 0x14b   : > { %v186_v20 = vsub.f32 %v175_v16, %v185_v17 }
 0x14d   : > { %v190_v21 = vmul.f32 %v279_v19, %v186_v20 }
 0x14f   : > { %v192_v22 = vsel %vm191_vm3, %v190_v21, 0.0 }
 0x150   : > { %193 = vadd.xlane.f32.xlu1 %v192_v22 }
 0x1dd   : > { %v194_v23 = vpop.xlane.xlu1 %193 }
 0x1de   : > { %v195_v24 = vrot.slane %v194_v23, 4 }
 0x1e0   : > { %v196_v25 = vadd.f32 %v195_v24, %v194_v23 }
 0x1e2   : > { %v197_v26 = vrot.slane %v196_v25, 2 }
 0x1e4   : > { %v198_v27 = vadd.f32 %v197_v26, %v196_v25 }
 0x1e6   : > { %v199_v28 = vrot.slane %v198_v27, 1 }
 0x1e8   : > { %v200_v29 = vadd.f32 %v199_v28, %v198_v27 }
 0x1ea   : > { %284 = vpush %v200_v29 }
 0x21b   : > { %s285_s22 = spop %284 }
 0x21c   : > { %v202_v30 = vstv %s285_s22 }
 0x21d   : > { %203 = vst [vmem:[%s161_s21] sm:$0xff] %v202_v30 }
 0x21e PF: > { %s12_s9 = sadd.s32 1, %s307_s9  }
 0x21f   : > { %p9_p4 = scmp.ge.s32.totalorder %s12_s9, 4  }
 0x221   :  { %11 = sbr.rel (!%p9_p4) target bundleno = 1 (0x1), region = 61 }

// kernel: _lambda_.2
= control target key start
LH: loop header
LB: loop body
LE: loop exit
PB: predicated region body
PF: predicated region fallthrough
CT: control target
= control target key end

     0   :  { %vm19_vm0 = vcmask 785408   ;;  %v69_v8 = vlaneseq  ;;  %v1176_v15 = vmov 0.0   ;;  %s1487_s0 = inlined_call_operand.vmem [shape: f32[2,16,96], index: 0, kind: input, shape index: {}]   ;;  %s1488_s1 = inlined_call_operand.vmem [shape: s32[2,128], index: 1, kind: input, shape index: {}]   ;;  %s1489_s2 = inlined_call_operand.vmem [shape: s32[2,1], index: 2, kind: input, shape index: {}]   ;;  %s1490_s3 = inlined_call_operand.vmem [shape: f32[2,128], index: 3, kind: output, shape index: {}]  }
   0x1   :  { %v17_v0 = vld [vmem:[%s1487_s0 + $0x10] sm:$0xff]  ;;  %v18_v1 = vld [vmem:[%s1487_s0 + $0x18] sm:$0xff]  ;;  %v15_v2 = vld [vmem:[%s1487_s0] sm:$0xff]  ;;  %1009 = vmatprep.subr.bf16.mxu1 %v1176_v15  ;;  %989 = vmatprep.subr.bf16.mxu0 %v1176_v15 }
   0x2   :  { %v26_v3 = vsel %vm19_vm0, %v17_v0, -inf  ;;  %v20_v4 = vsel %vm19_vm0, %v15_v2, -inf  ;;  %v16_v5 = vld [vmem:[%s1487_s0 + $0x8] sm:$0xff]  ;;  %v29_v6 = vsel %vm19_vm0, %v18_v1, -inf  ;;  %v72_v9 = vshrl.u32 %v69_v8, 7  ;;  %s1178_s0 = smov 2  }
   0x3   :  { %27 = vmax.xlane.f32.xlu0 %v26_v3  ;;  %21 = vmax.xlane.f32.xlu1 %v20_v4  ;;  %v23_v7 = vsel %vm19_vm0, %v16_v5, -inf  ;;  %v1220_v11 = vld [vmem:[%s1488_s1] sm:$0x3]  ;;  %v1248_v24 = vand.u32 127, %v69_v8  ;;  %s1179_s1 = smov 1  }
   0x4   :  { %v140_v10 = vsub.s32 1, %v72_v9  ;;  %v73_v13 = vsub.s32 0, %v72_v9 }
   0x6   :  { %v141_v12 = vrot.slane %v1220_v11, %v140_v10  ;;  %v1224_v14 = vrot.slane %v1220_v11, %v73_v13 }
   0x7   :  { %30 = vmax.xlane.f32.xlu0 %v29_v6  ;;  %24 = vmax.xlane.f32.xlu1 %v23_v7 }
  0x18   :  { %147 = vbcast.lane.b32.xlu1 %v141_v12, 264 }
  0x1c   :  { %76 = vbcast.lane.b32.xlu1 %v1224_v14, 256 }
  0x1d   :  { %143 = vbcast.lane.b32.xlu0 %v141_v12, 256 }
  0x20   :  { %80 = vbcast.lane.b32.xlu1 %v1224_v14, 264 }
  0x21   :  { %151 = vbcast.lane.b32.xlu0 %v141_v12, 272 }
  0x24   :  { %155 = vbcast.lane.b32.xlu1 %v141_v12, 280 }
  0x25   :  { %84 = vbcast.lane.b32.xlu0 %v1224_v14, 272 }
  0x28   :  { %88 = vbcast.lane.b32.xlu1 %v1224_v14, 280 }
  0x29   :  { %159 = vbcast.lane.b32.xlu0 %v141_v12, 288 }
  0x2c   :  { %163 = vbcast.lane.b32.xlu1 %v141_v12, 296 }
  0x2d   :  { %92 = vbcast.lane.b32.xlu0 %v1224_v14, 288 }
  0x30   :  { %96 = vbcast.lane.b32.xlu1 %v1224_v14, 296 }
  0x31   :  { %167 = vbcast.lane.b32.xlu0 %v141_v12, 304 }
  0x34   :  { %171 = vbcast.lane.b32.xlu1 %v141_v12, 312 }
  0x35   :  { %100 = vbcast.lane.b32.xlu0 %v1224_v14, 304 }
  0x38   :  { %104 = vbcast.lane.b32.xlu1 %v1224_v14, 312 }
  0x39   :  { %175 = vbcast.lane.b32.xlu0 %v141_v12, 320 }
  0x3c   :  { %179 = vbcast.lane.b32.xlu1 %v141_v12, 328 }
  0x3d   :  { %108 = vbcast.lane.b32.xlu0 %v1224_v14, 320 }
  0x40   :  { %112 = vbcast.lane.b32.xlu1 %v1224_v14, 328 }
  0x41   :  { %183 = vbcast.lane.b32.xlu0 %v141_v12, 336 }
  0x44   :  { %187 = vbcast.lane.b32.xlu1 %v141_v12, 344 }
  0x45   :  { %191 = vbcast.lane.b32.xlu0 %v141_v12, 352 }
  0x48   :  { %116 = vbcast.lane.b32.xlu1 %v1224_v14, 336 }
  0x49   :  { %124 = vbcast.lane.b32.xlu0 %v1224_v14, 352 }
  0x4c   :  { %120 = vbcast.lane.b32.xlu1 %v1224_v14, 344 }
  0x4d   :  { %199 = vbcast.lane.b32.xlu0 %v141_v12, 368 }
  0x50   :  { %195 = vbcast.lane.b32.xlu1 %v141_v12, 360 }
  0x54   :  { %128 = vbcast.lane.b32.xlu1 %v1224_v14, 360 }
  0x58   :  { %203 = vbcast.lane.b32.xlu1 %v141_v12, 376 }
  0x90   :  { %v28_v16 = vpop.xlane.xlu0 %27  ;;  %v22_v17 = vpop.xlane.xlu1 %21 }
  0x91   :  { %v1242_v18 = vsub.f32 %v17_v0, %v28_v16  ;;  %v1244_v19 = vsub.f32 %v15_v2, %v22_v17 }
  0x93   :  { %v40_v20 = vmul.f32 1.442695, %v1242_v18  ;;  %v36_v21 = vmul.f32 1.442695, %v1244_v19 }
  0x94   :  { %v31_v22 = vpop.xlane.xlu0 %30  ;;  %v25_v23 = vpop.xlane.xlu1 %24 }
  0x95   :  { %1036 = vpow2.f32 %v40_v20  ;;  %v1250_v25 = vsub.f32 %v18_v1, %v31_v22  ;;  %v1252_v26 = vsub.f32 %v16_v5, %v25_v23 }
  0x96   :  { %1038 = vpow2.f32 %v36_v21 }
  0x97   :  { %v42_v27 = vmul.f32 1.442695, %v1250_v25  ;;  %v38_v28 = vmul.f32 1.442695, %v1252_v26 }
  0x98   :  { %v148_v29 = vpop.permute.xlu1 %147  ;;  %v144_v30 = vpop.permute.xlu0 %143 }
  0x99   :  { %1040 = vpow2.f32 %v42_v27  ;;  %vm222_vm1 = vcmp.eq.s32.totalorder %v1248_v24, %v148_v29  ;;  %vm221_vm2 = vcmp.eq.s32.totalorder %v1248_v24, %v144_v30 }
  0x9a   :  { %1042 = vpow2.f32 %v38_v28  ;;  %v953_v31 = vsel %vm222_vm1, 1.0, %v1176_v15  ;;  %v952_v32 = vsel %vm221_vm2, 1.0, %v1176_v15 }
  0x9b   :  { %v309_v33 = vpack.c.bf16 %v953_v31, %v952_v32 }
  0x9c   :  { %v77_v34 = vpop.permute.xlu1 %76  ;;  %v152_v35 = vpop.permute.xlu0 %151 }
  0x9d   :  { %vm205_vm3 = vcmp.eq.s32.totalorder %v1248_v24, %v77_v34  ;;  %v391_v36 = vsel %vm19_vm0, %v309_v33, 0  ;;  %vm223_vm5 = vcmp.eq.s32.totalorder %v1248_v24, %v152_v35 }
  0x9e   :  { %1010 = vmatpush3.bf16.xpose.msra.mxu1 %v391_v36  ;;  %v936_v40 = vsel %vm205_vm3, 1.0, %v1176_v15  ;;  %v954_v50 = vsel %vm223_vm5, 1.0, %v1176_v15 }
  0x9f   :  { %v1037_v37 = vpop.eup %1036  ;;  %1011 = vmatprep.subr.bf16.mxu1 %v1176_v15 }
  0xa0   :  { %v1039_v38 = vpop.eup %1038  ;;  %v50_v39 = vsel %vm19_vm0, %v1037_v37, 0.0  ;;  %v81_v41 = vpop.permute.xlu1 %80 }
  0xa1   :  { %v85_v42 = vpop.permute.xlu0 %84  ;;  %51 = vadd.xlane.f32.xlu0 %v50_v39  ;;  %vm206_vm4 = vcmp.eq.s32.totalorder %v1248_v24, %v81_v41  ;;  %v44_v43 = vsel %vm19_vm0, %v1039_v38, 0.0 }
  0xa2   :  { %v937_v44 = vsel %vm206_vm4, 1.0, %v1176_v15  ;;  %vm207_vm7 = vcmp.eq.s32.totalorder %v1248_v24, %v85_v42 }
  0xa3   :  { %v1041_v45 = vpop.eup %1040  ;;  %v301_v46 = vpack.c.bf16 %v937_v44, %v936_v40  ;;  %v938_v57 = vsel %vm207_vm7, 1.0, %v1176_v15  ;;  %vm1177_vm7 = vmmov 0  }
  0xa4   :  { %v1043_v47 = vpop.eup %1042  ;;  %v53_v48 = vsel %vm19_vm0, %v1041_v45, 0.0  ;;  %v156_v49 = vpop.permute.xlu1 %155  ;;  %1025 = vmatprep.mubr.msk.bf16.mxu1 %vm1177_vm7, %v1176_v15  ;;  %1005 = vmatprep.mubr.msk.bf16.mxu0 %vm1177_vm7, %v1176_v15  ;;  %vm472_vm7 = vcmask 1044484  }
  0xa5   :  { %v160_v51 = vpop.permute.xlu0 %159  ;;  %54 = vadd.xlane.f32.xlu1 %v53_v48  ;;  %45 = vadd.xlane.f32.xlu0 %v44_v43  ;;  %vm224_vm6 = vcmp.eq.s32.totalorder %v1248_v24, %v156_v49  ;;  %v323_v52 = vsel %vm19_vm0, %v301_v46, 0  ;;  %v47_v53 = vsel %vm19_vm0, %v1043_v47, 0.0 }
  0xa6   :  { %v955_v54 = vsel %vm224_vm6, 1.0, %v1176_v15  ;;  %990 = vmatpush3.bf16.xpose.msra.mxu0 %v323_v52  ;;  %vm225_vm9 = vcmp.eq.s32.totalorder %v1248_v24, %v160_v51 }
  0xa7   :  { %v310_v55 = vpack.c.bf16 %v955_v54, %v954_v50  ;;  %991 = vmatprep.subr.bf16.mxu0 %v1176_v15  ;;  %v956_v63 = vsel %vm225_vm9, 1.0, %v1176_v15 }
  0xa8   :  { %v89_v56 = vpop.permute.xlu1 %88 }
  0xa9   :  { %v93_v58 = vpop.permute.xlu0 %92  ;;  %48 = vadd.xlane.f32.xlu0 %v47_v53  ;;  %vm208_vm8 = vcmp.eq.s32.totalorder %v1248_v24, %v89_v56  ;;  %v394_v59 = vsel %vm19_vm0, %v310_v55, 0 }
  0xaa   :  { %v939_v60 = vsel %vm208_vm8, 1.0, %v1176_v15  ;;  %1012 = vmatpush3.bf16.xpose.msra.mxu1 %v394_v59  ;;  %vm209_vm11 = vcmp.eq.s32.totalorder %v1248_v24, %v93_v58 }
  0xab   :  { %v302_v61 = vpack.c.bf16 %v939_v60, %v938_v57  ;;  %1013 = vmatprep.subr.bf16.mxu1 %v1176_v15  ;;  %v940_v5 = vsel %vm209_vm11, 1.0, %v1176_v15 }
  0xac   :  { %v164_v62 = vpop.permute.xlu1 %163 }
  0xad   :  { %v168_v0 = vpop.permute.xlu0 %167  ;;  %vm226_vm10 = vcmp.eq.s32.totalorder %v1248_v24, %v164_v62  ;;  %v326_v1 = vsel %vm19_vm0, %v302_v61, 0 }
  0xae   :  { %v957_v2 = vsel %vm226_vm10, 1.0, %v1176_v15  ;;  %992 = vmatpush3.bf16.xpose.msra.mxu0 %v326_v1  ;;  %vm227_vm13 = vcmp.eq.s32.totalorder %v1248_v24, %v168_v0 }
  0xaf   :  { %v311_v3 = vpack.c.bf16 %v957_v2, %v956_v63  ;;  %993 = vmatprep.subr.bf16.mxu0 %v1176_v15  ;;  %v958_v12 = vsel %vm227_vm13, 1.0, %v1176_v15 }
  0xb0   :  { %v97_v4 = vpop.permute.xlu1 %96 }
  0xb1   :  { %v101_v6 = vpop.permute.xlu0 %100  ;;  %vm210_vm12 = vcmp.eq.s32.totalorder %v1248_v24, %v97_v4  ;;  %v397_v7 = vsel %vm19_vm0, %v311_v3, 0 }
  0xb2   :  { %v941_v8 = vsel %vm210_vm12, 1.0, %v1176_v15  ;;  %1014 = vmatpush3.bf16.xpose.msra.mxu1 %v397_v7  ;;  %vm211_vm15 = vcmp.eq.s32.totalorder %v1248_v24, %v101_v6 }
  0xb3   :  { %v303_v9 = vpack.c.bf16 %v941_v8, %v940_v5  ;;  %1015 = vmatprep.subr.bf16.mxu1 %v1176_v15  ;;  %v942_v22 = vsel %vm211_vm15, 1.0, %v1176_v15 }
  0xb4   :  { %v172_v10 = vpop.permute.xlu1 %171 }
  0xb5   :  { %v176_v13 = vpop.permute.xlu0 %175  ;;  %vm228_vm14 = vcmp.eq.s32.totalorder %v1248_v24, %v172_v10  ;;  %v329_v16 = vsel %vm19_vm0, %v303_v9, 0 }
  0xb6   :  { %136 = vbcast.lane.b32.xlu1 %v1224_v14, 376  ;;  %v959_v17 = vsel %vm228_vm14, 1.0, %v1176_v15  ;;  %994 = vmatpush3.bf16.xpose.msra.mxu0 %v329_v16  ;;  %vm229_vm2 = vcmp.eq.s32.totalorder %v1248_v24, %v176_v13 }
  0xb7   :  { %v312_v20 = vpack.c.bf16 %v959_v17, %v958_v12  ;;  %995 = vmatprep.subr.bf16.mxu0 %v1176_v15  ;;  %v960_v31 = vsel %vm229_vm2, 1.0, %v1176_v15 }
  0xb8   :  { %v105_v21 = vpop.permute.xlu1 %104 }
  0xb9   :  { %v109_v23 = vpop.permute.xlu0 %108  ;;  %vm212_vm1 = vcmp.eq.s32.totalorder %v1248_v24, %v105_v21  ;;  %v400_v27 = vsel %vm19_vm0, %v312_v20, 0 }
  0xba   :  { %v943_v28 = vsel %vm212_vm1, 1.0, %v1176_v15  ;;  %1016 = vmatpush3.bf16.xpose.msra.mxu1 %v400_v27  ;;  %vm213_vm4 = vcmp.eq.s32.totalorder %v1248_v24, %v109_v23 }
  0xbb   :  { %v304_v29 = vpack.c.bf16 %v943_v28, %v942_v22  ;;  %1017 = vmatprep.subr.bf16.mxu1 %v1176_v15  ;;  %v944_v37 = vsel %vm213_vm4, 1.0, %v1176_v15  ;;  %vm458_vm4 = vcmask 1041409  }
  0xbc   :  { %v180_v30 = vpop.permute.xlu1 %179 }
  0xbd   :  { %vm230_vm3 = vcmp.eq.s32.totalorder %v1248_v24, %v180_v30  ;;  %v332_v32 = vsel %vm19_vm0, %v304_v29, 0  ;;  %v184_v34 = vpop.permute.xlu0 %183 }
  0xbe   :  { %v961_v33 = vsel %vm230_vm3, 1.0, %v1176_v15  ;;  %996 = vmatpush3.bf16.xpose.msra.mxu0 %v332_v32  ;;  %vm231_vm6 = vcmp.eq.s32.totalorder %v1248_v24, %v184_v34 }
  0xbf   :  { %132 = vbcast.lane.b32.xlu0 %v1224_v14, 368  ;;  %v313_v35 = vpack.c.bf16 %v961_v33, %v960_v31  ;;  %997 = vmatprep.subr.bf16.mxu0 %v1176_v15  ;;  %v962_v14 = vsel %vm231_vm6, 1.0, %v1176_v15  ;;  %vm467_vm6 = vcmask 1043459  }
  0xc0   :  { %v113_v36 = vpop.permute.xlu1 %112 }
  0xc1   :  { %vm214_vm5 = vcmp.eq.s32.totalorder %v1248_v24, %v113_v36  ;;  %v403_v38 = vsel %vm19_vm0, %v313_v35, 0  ;;  %v192_v44 = vpop.permute.xlu0 %191 }
  0xc2   :  { %v945_v39 = vsel %vm214_vm5, 1.0, %v1176_v15  ;;  %1018 = vmatpush3.bf16.xpose.msra.mxu1 %v403_v38  ;;  %vm233_vm11 = vcmp.eq.s32.totalorder %v1248_v24, %v192_v44  ;;  %vm462_vm5 = vcmask 1042434  }
  0xc3   :  { %v305_v40 = vpack.c.bf16 %v945_v39, %v944_v37  ;;  %1019 = vmatprep.subr.bf16.mxu1 %v1176_v15  ;;  %v964_v53 = vsel %vm233_vm11, 1.0, %v1176_v15  ;;  %536 = vrot.lane.b32.xlu0 %v1220_v11, %s1178_s0  ;;  %vm535_vm11 = vcmp.ne.s32.totalorder %v1220_v11, 0 }
  0xc4   :  { %v188_v41 = vpop.permute.xlu1 %187 }
  0xc5   :  { %vm232_vm8 = vcmp.eq.s32.totalorder %v1248_v24, %v188_v41  ;;  %v335_v42 = vsel %vm19_vm0, %v305_v40, 0  ;;  %v125_v50 = vpop.permute.xlu0 %124 }
  0xc6   :  { %v963_v43 = vsel %vm232_vm8, 1.0, %v1176_v15  ;;  %998 = vmatpush3.bf16.xpose.msra.mxu0 %v335_v42  ;;  %vm217_vm13 = vcmp.eq.s32.totalorder %v1248_v24, %v125_v50  ;;  %vm477_vm8 = vcmask 1045509  }
  0xc7   :  { %v314_v45 = vpack.c.bf16 %v963_v43, %v962_v14  ;;  %999 = vmatprep.subr.bf16.mxu0 %v1176_v15  ;;  %v948_v59 = vsel %vm217_vm13, 1.0, %v1176_v15  ;;  %vm534_vm13 = vcmp.ge.s32.totalorder %v1248_v24, 2 }
  0xc8   :  { %v117_v46 = vpop.permute.xlu1 %116 }
  0xc9   :  { %vm215_vm9 = vcmp.eq.s32.totalorder %v1248_v24, %v117_v46  ;;  %v406_v47 = vsel %vm19_vm0, %v314_v45, 0  ;;  %v200_v57 = vpop.permute.xlu0 %199 }
  0xca   :  { %1020 = vmatpush3.bf16.xpose.msra.mxu1 %v406_v47  ;;  %v946_v48 = vsel %vm215_vm9, 1.0, %v1176_v15  ;;  %vm235_vm15 = vcmp.eq.s32.totalorder %v1248_v24, %v200_v57  ;;  %vm482_vm9 = vcmask 1046534  }
  0xcb   :  { %1021 = vmatprep.subr.bf16.mxu1 %v1176_v15  ;;  %v966_v0 = vsel %vm235_vm15, 1.0, %v1176_v15  ;;  %vm533_vm15 = vcmp.ge.s32.totalorder %v1248_v24, 1 }
  0xcc   :  { %v121_v49 = vpop.permute.xlu1 %120 }
  0xcd   :  { %vm216_vm10 = vcmp.eq.s32.totalorder %v1248_v24, %v121_v49 }
  0xce   :  { %v947_v51 = vsel %vm216_vm10, 1.0, %v1176_v15  ;;  %vm487_vm10 = vcmask 1047559  }
  0xcf   :  { %v306_v52 = vpack.c.bf16 %v947_v51, %v946_v48 }
  0xd0   :  { %v196_v54 = vpop.permute.xlu1 %195 }
  0xd1   :  { %v338_v55 = vsel %vm19_vm0, %v306_v52, 0  ;;  %vm234_vm12 = vcmp.eq.s32.totalorder %v1248_v24, %v196_v54 }
  0xd2   :  { %1000 = vmatpush3.bf16.xpose.msra.mxu0 %v338_v55  ;;  %v965_v56 = vsel %vm234_vm12, 1.0, %v1176_v15 }
  0xd3   :  { %v315_v58 = vpack.c.bf16 %v965_v56, %v964_v53  ;;  %1001 = vmatprep.subr.bf16.mxu0 %v1176_v15 }
  0xd4   :  { %v129_v60 = vpop.permute.xlu1 %128 }
  0xd5   :  { %vm218_vm14 = vcmp.eq.s32.totalorder %v1248_v24, %v129_v60  ;;  %v409_v61 = vsel %vm19_vm0, %v315_v58, 0 }
  0xd6   :  { %v949_v62 = vsel %vm218_vm14, 1.0, %v1176_v15  ;;  %1022 = vmatpush3.bf16.xpose.msra.mxu1 %v409_v61 }
  0xd7   :  { %v307_v63 = vpack.c.bf16 %v949_v62, %v948_v59  ;;  %1023 = vmatprep.subr.bf16.mxu1 %v1176_v15 }
  0xd8   :  { %v204_v1 = vpop.permute.xlu1 %203 }
  0xd9   :  { %vm236_vm1 = vcmp.eq.s32.totalorder %v1248_v24, %v204_v1  ;;  %v341_v2 = vsel %vm19_vm0, %v307_v63, 0 }
  0xda   :  { %v967_v3 = vsel %vm236_vm1, 1.0, %v1176_v15  ;;  %1002 = vmatpush3.bf16.xpose.msra.mxu0 %v341_v2 }
  0xdb   :  { %v316_v4 = vpack.c.bf16 %v967_v3, %v966_v0  ;;  %1003 = vmatprep.subr.bf16.mxu0 %v1176_v15 }
  0xdd   :  { %v412_v5 = vsel %vm19_vm0, %v316_v4, 0 }
  0xde   :  { %1024 = vmatpush3.bf16.xpose.msra.mxu1 %v412_v5 }
 0x12e   :  { %v52_v6 = vpop.xlane.xlu0 %51 }
 0x12f   :  { %1044 = vlog2.f32 %v52_v6 }
 0x132   :  { %v46_v7 = vpop.xlane.xlu0 %45  ;;  %v55_v8 = vpop.xlane.xlu1 %54 }
 0x133   :  { %1046 = vlog2.f32 %v46_v7 }
 0x134   :  { %1048 = vlog2.f32 %v55_v8 }
 0x136   :  { %v49_v9 = vpop.xlane.xlu0 %48  ;;  %v137_v10 = vpop.permute.xlu1 %136 }
 0x137   :  { %1050 = vlog2.f32 %v49_v9  ;;  %vm220_vm2 = vcmp.eq.s32.totalorder %v1248_v24, %v137_v10 }
 0x138   :  { %v951_v16 = vsel %vm220_vm2, 1.0, %v1176_v15 }
 0x139   :  { %v1045_v12 = vpop.eup %1044 }
 0x13a   :  { %v133_v13 = vpop.permute.xlu0 %132  ;;  %v61_v21 = vmul.f32 0.6931472, %v1045_v12 }
 0x13b   :  { %vm219_vm3 = vcmp.eq.s32.totalorder %v1248_v24, %v133_v13 }
 0x13c   :  { %v950_v17 = vsel %vm219_vm3, 1.0, %v1176_v15  ;;  %v66_v31 = vsub.f32 %v1242_v18, %v61_v21 }
 0x13d   :  { %v1047_v20 = vpop.eup %1046  ;;  %v308_v22 = vpack.c.bf16 %v951_v16, %v950_v17 }
 0x13e   :  { %v1049_v23 = vpop.eup %1048  ;;  %v57_v29 = vmul.f32 0.6931472, %v1047_v20  ;;  %v537_v58 = vpop.permute.xlu0 %536 }
 0x13f   :  { %v63_v27 = vmul.f32 0.6931472, %v1049_v23  ;;  %v344_v28 = vsel %vm19_vm0, %v308_v22, 0  ;;  %vm538_vm12 = vcmp.ne.s32.totalorder %v1220_v11, %v537_v58 }
 0x140   :  { %1004 = vmatpush3.bf16.xpose.msra.mxu0 %v344_v28  ;;  %v64_v35 = vsub.f32 %v1244_v19, %v57_v29  ;;  %vm539_vm14 = vmand %vm535_vm11, %vm538_vm12 }
 0x141   :  { %v1051_v30 = vpop.eup %1050  ;;  %v67_v32 = vsub.f32 %v1250_v25, %v63_v27  ;;  %vm1387_vm1 = vmand %vm534_vm13, %vm539_vm14 }
 0x142   :  { %v59_v33 = vmul.f32 0.6931472, %v1051_v30 }
 0x143   :  { %v318_v34 = vpack.c.bf16 %v67_v32, %v66_v31 }
 0x144   :  { %v65_v15 = vsub.f32 %v1252_v26, %v59_v33 }
 0x145   :  { %1026 = vmatmul.mubr.msk.bf16.vlgmr.msra.gmra.mrb[0].mxu1 %vm19_vm0, %v318_v34 }
 0x146   :  { %v317_v36 = vpack.c.bf16 %v65_v15, %v64_v35 }
 0x148   :  { %1006 = vmatmul.mubr.msk.bf16.vlgmr.msra.gmra.mrb[0].mxu0 %vm19_vm0, %v317_v36  ;;  %vm553_vm0 = vcmp.lt.s32.totalorder %v1248_v24, 2 }
 0x218   :  { %v448_v37 = vpop.f32.mrb[0].mxu1 }
 0x219   :  { %v457_v18 = vrot.slane %v448_v37, 7  ;;  %v1027_v38 = vpop.f32.mrb[1].mxu1 }
 0x21a   :  { %v451_v25 = vpop.f32.mrb[2].mxu1 }
 0x21b   :  { %496 = vst [vmem:[#allocation2 + $0xf] sm:$0x1] %v457_v18  ;;  %v499_v19 = vrot.slane %v451_v25, 7  ;;  %v1028_v26 = vpop.f32.mrb[3].mxu1  ;;  %v380_v39 = vpop.f32.mrb[0].mxu0 }
 0x21c   :  { %v459_v40 = vsel %vm458_vm4, %v457_v18, %v380_v39  ;;  %v463_v41 = vsel %vm462_vm5, %v457_v18, %v380_v39  ;;  %v468_v14 = vsel %vm467_vm6, %v457_v18, %v380_v39  ;;  %v473_v42 = vsel %vm472_vm7, %v457_v18, %v380_v39  ;;  %495 = vst [vmem:[#allocation2 + $0x7] sm:$0x80] %v380_v39  ;;  %v1007_v43 = vpop.f32.mrb[1].mxu0 }
 0x21d   :  { %532 = vst [vmem:[#allocation2 + $0x1f] sm:$0x1] %v499_v19  ;;  %461 = vst [vmem:[#allocation2] sm:$0x3] %v459_v40  ;;  %v478_v44 = vsel %vm477_vm8, %v457_v18, %v380_v39  ;;  %v483_v45 = vsel %vm482_vm9, %v457_v18, %v380_v39  ;;  %v488_v46 = vsel %vm487_vm10, %v457_v18, %v380_v39  ;;  %v383_v47 = vpop.f32.mrb[2].mxu0 }
 0x21e   :  { %466 = vst [vmem:[#allocation2 + $0x1] sm:$0x6] %v463_v41  ;;  %471 = vst [vmem:[#allocation2 + $0x2] sm:$0xc] %v468_v14  ;;  %v500_v48 = vsel %vm458_vm4, %v499_v19, %v383_v47  ;;  %v504_v49 = vsel %vm462_vm5, %v499_v19, %v383_v47  ;;  %v508_v50 = vsel %vm467_vm6, %v499_v19, %v383_v47  ;;  %v1008_v52 = vpop.f32.mrb[3].mxu0  ;;  %vm917_vm5 = vcmask 1041408  }
 0x21f   :  { %476 = vst [vmem:[#allocation2 + $0x3] sm:$0x18] %v473_v42  ;;  %481 = vst [vmem:[#allocation2 + $0x4] sm:$0x30] %v478_v44  ;;  %v512_v51 = vsel %vm472_vm7, %v499_v19, %v383_v47  ;;  %v516_v53 = vsel %vm477_vm8, %v499_v19, %v383_v47  ;;  %v520_v54 = vsel %vm482_vm9, %v499_v19, %v383_v47 }
 0x220   :  { %486 = vst [vmem:[#allocation2 + $0x5] sm:$0x60] %v483_v45  ;;  %491 = vst [vmem:[#allocation2 + $0x6] sm:$0xc0] %v488_v46  ;;  %v524_v55 = vsel %vm487_vm10, %v499_v19, %v383_v47 }
 0x221   :  { %531 = vst [vmem:[#allocation2 + $0x17] sm:$0x80] %v383_v47  ;;  %503 = vst [vmem:[#allocation2 + $0x10] sm:$0x3] %v500_v48 }
 0x222   :  { %507 = vst [vmem:[#allocation2 + $0x11] sm:$0x6] %v504_v49  ;;  %511 = vst [vmem:[#allocation2 + $0x12] sm:$0xc] %v508_v50 }
 0x223   :  { %515 = vst [vmem:[#allocation2 + $0x13] sm:$0x18] %v512_v51  ;;  %519 = vst [vmem:[#allocation2 + $0x14] sm:$0x30] %v516_v53 }
 0x224   :  { %523 = vst [vmem:[#allocation2 + $0x15] sm:$0x60] %v520_v54  ;;  %527 = vst [vmem:[#allocation2 + $0x16] sm:$0xc0] %v524_v55  ;;  %v554_v56 = vld [vmem:[#allocation2] sm:$0x3] }
 0x225   :  { %v555_v57 = vsel %vm553_vm0, %v554_v56, -1e+30  ;;  %v556_v20 = vld [vmem:[#allocation2 + $0x2] sm:$0x3]  ;;  %v580_v40 = vld [vmem:[#allocation2 + $0x4] sm:$0x3] }
 0x226   :  { %560 = vrot.lane.b32.xlu0 %v555_v57, %s1178_s0  ;;  %557 = vrot.lane.b32.xlu1 %v555_v57, %s1179_s1 }
 0x298   :  { %v561_v60 = vpop.permute.xlu0 %560  ;;  %v558_v61 = vpop.permute.xlu1 %557 }
 0x299   :  { %v559_v62 = vsel %vm533_vm15, %v558_v61, -1e+30  ;;  %v562_v0 = vsel %vm1387_vm1, %v561_v60, -1e+30 }
 0x29a   :  { %v563_v63 = vmax.f32 %v555_v57, %v559_v62 }
 0x29c   :  { %v564_v1 = vmax.f32 %v563_v63, %v562_v0 }
 0x29e   :  { %v565_v11 = vsub.f32 %v555_v57, %v564_v1  ;;  %v568_v2 = vsub.f32 %v559_v62, %v564_v1  ;;  %v572_v3 = vsub.f32 %v562_v0, %v564_v1  ;;  %v604_v62 = vld [vmem:[#allocation2 + $0x6] sm:$0x3] }
 0x2a0   :  { %v566_v4 = vmul.f32 1.442695, %v565_v11  ;;  %v569_v5 = vmul.f32 1.442695, %v568_v2  ;;  %v573_v6 = vmul.f32 1.442695, %v572_v3 }
 0x2a2   :  { %1052 = vpow2.f32 %v566_v4 }
 0x2a3   :  { %1054 = vpow2.f32 %v569_v5 }
 0x2a4   :  { %1056 = vpow2.f32 %v573_v6 }
 0x2ac   :  { %v1053_v7 = vpop.eup %1052 }
 0x2ad   :  { %v1055_v8 = vpop.eup %1054 }
 0x2ae   :  { %v571_v9 = vadd.f32 %v1055_v8, %v1053_v7  ;;  %v1057_v10 = vpop.eup %1056 }
 0x2b0   :  { %v575_v12 = vadd.f32 %v1057_v10, %v571_v9 }
 0x2b2   :  { %1058 = vlog2.f32 %v575_v12 }
 0x2bc   :  { %v1059_v13 = vpop.eup %1058 }
 0x2bd   :  { %v577_v16 = vmul.f32 0.6931472, %v1059_v13 }
 0x2bf   :  { %v578_v17 = vadd.f32 %v577_v16, %v564_v1 }
 0x2c1   :  { %v579_v21 = vadd.f32 %v578_v17, %v556_v20 }
 0x2c3   :  { %584 = vrot.lane.b32.xlu0 %v579_v21, %s1178_s0  ;;  %581 = vrot.lane.b32.xlu1 %v579_v21, %s1179_s1 }
 0x335   :  { %v585_v22 = vpop.permute.xlu0 %584  ;;  %v582_v23 = vpop.permute.xlu1 %581 }
 0x336   :  { %v583_v27 = vsel %vm533_vm15, %v582_v23, -1e+30  ;;  %v586_v29 = vsel %vm1387_vm1, %v585_v22, -1e+30 }
 0x337   :  { %v587_v28 = vmax.f32 %v579_v21, %v583_v27 }
 0x339   :  { %v588_v30 = vmax.f32 %v587_v28, %v586_v29 }
 0x33b   :  { %v589_v31 = vsub.f32 %v579_v21, %v588_v30  ;;  %v592_v32 = vsub.f32 %v583_v27, %v588_v30  ;;  %v596_v33 = vsub.f32 %v586_v29, %v588_v30  ;;  %v628_v27 = vld [vmem:[#allocation2 + $0x8] sm:$0x3] }
 0x33d   :  { %v590_v34 = vmul.f32 1.442695, %v589_v31  ;;  %v593_v35 = vmul.f32 1.442695, %v592_v32  ;;  %v597_v15 = vmul.f32 1.442695, %v596_v33 }
 0x33f   :  { %1060 = vpow2.f32 %v590_v34 }
 0x340   :  { %1062 = vpow2.f32 %v593_v35 }
 0x341   :  { %1064 = vpow2.f32 %v597_v15 }
 0x349   :  { %v1061_v36 = vpop.eup %1060 }
 0x34a   :  { %v1063_v37 = vpop.eup %1062 }
 0x34b   :  { %v595_v18 = vadd.f32 %v1063_v37, %v1061_v36  ;;  %v1065_v38 = vpop.eup %1064 }
 0x34d   :  { %v599_v25 = vadd.f32 %v1065_v38, %v595_v18 }
 0x34f   :  { %1066 = vlog2.f32 %v599_v25 }
 0x359   :  { %v1067_v19 = vpop.eup %1066 }
 0x35a   :  { %v601_v26 = vmul.f32 0.6931472, %v1067_v19 }
 0x35c   :  { %v602_v39 = vadd.f32 %v601_v26, %v588_v30 }
 0x35e   :  { %v603_v41 = vadd.f32 %v602_v39, %v580_v40 }
 0x360   :  { %608 = vrot.lane.b32.xlu0 %v603_v41, %s1178_s0  ;;  %605 = vrot.lane.b32.xlu1 %v603_v41, %s1179_s1 }
 0x3d2   :  { %v609_v14 = vpop.permute.xlu0 %608  ;;  %v606_v42 = vpop.permute.xlu1 %605 }
 0x3d3   :  { %v607_v43 = vsel %vm533_vm15, %v606_v42, -1e+30  ;;  %v610_v45 = vsel %vm1387_vm1, %v609_v14, -1e+30 }
 0x3d4   :  { %v611_v44 = vmax.f32 %v603_v41, %v607_v43 }
 0x3d6   :  { %v612_v46 = vmax.f32 %v611_v44, %v610_v45 }
 0x3d8   :  { %v613_v47 = vsub.f32 %v603_v41, %v612_v46  ;;  %v616_v48 = vsub.f32 %v607_v43, %v612_v46  ;;  %v620_v49 = vsub.f32 %v610_v45, %v612_v46  ;;  %v652_v43 = vld [vmem:[#allocation2 + $0xa] sm:$0x3] }
 0x3da   :  { %v614_v50 = vmul.f32 1.442695, %v613_v47  ;;  %v617_v51 = vmul.f32 1.442695, %v616_v48  ;;  %v621_v52 = vmul.f32 1.442695, %v620_v49 }
 0x3dc   :  { %1068 = vpow2.f32 %v614_v50 }
 0x3dd   :  { %1070 = vpow2.f32 %v617_v51 }
 0x3de   :  { %1072 = vpow2.f32 %v621_v52 }
 0x3e6   :  { %v1069_v53 = vpop.eup %1068 }
 0x3e7   :  { %v1071_v54 = vpop.eup %1070 }
 0x3e8   :  { %v619_v55 = vadd.f32 %v1071_v54, %v1069_v53  ;;  %v1073_v56 = vpop.eup %1072 }
 0x3ea   :  { %v623_v57 = vadd.f32 %v1073_v56, %v619_v55 }
 0x3ec   :  { %1074 = vlog2.f32 %v623_v57 }
 0x3f6   :  { %v1075_v58 = vpop.eup %1074 }
 0x3f7   :  { %v625_v60 = vmul.f32 0.6931472, %v1075_v58 }
 0x3f9   :  { %v626_v61 = vadd.f32 %v625_v60, %v612_v46 }
 0x3fb   :  { %v627_v63 = vadd.f32 %v626_v61, %v604_v62 }
 0x3fd   :  { %632 = vrot.lane.b32.xlu0 %v627_v63, %s1178_s0  ;;  %629 = vrot.lane.b32.xlu1 %v627_v63, %s1179_s1 }
 0x46f   :  { %v633_v0 = vpop.permute.xlu0 %632  ;;  %v630_v1 = vpop.permute.xlu1 %629 }
 0x470   :  { %v631_v11 = vsel %vm533_vm15, %v630_v1, -1e+30  ;;  %v634_v3 = vsel %vm1387_vm1, %v633_v0, -1e+30 }
 0x471   :  { %v635_v2 = vmax.f32 %v627_v63, %v631_v11 }
 0x473   :  { %v636_v4 = vmax.f32 %v635_v2, %v634_v3 }
 0x475   :  { %v637_v5 = vsub.f32 %v627_v63, %v636_v4  ;;  %v640_v6 = vsub.f32 %v631_v11, %v636_v4  ;;  %v644_v7 = vsub.f32 %v634_v3, %v636_v4  ;;  %v676_v11 = vld [vmem:[#allocation2 + $0xc] sm:$0x3] }
 0x477   :  { %v638_v8 = vmul.f32 1.442695, %v637_v5  ;;  %v641_v9 = vmul.f32 1.442695, %v640_v6  ;;  %v645_v10 = vmul.f32 1.442695, %v644_v7 }
 0x479   :  { %1076 = vpow2.f32 %v638_v8 }
 0x47a   :  { %1078 = vpow2.f32 %v641_v9 }
 0x47b   :  { %1080 = vpow2.f32 %v645_v10 }
 0x483   :  { %v1077_v12 = vpop.eup %1076 }
 0x484   :  { %v1079_v13 = vpop.eup %1078 }
 0x485   :  { %v643_v16 = vadd.f32 %v1079_v13, %v1077_v12  ;;  %v1081_v17 = vpop.eup %1080 }
 0x487   :  { %v647_v20 = vadd.f32 %v1081_v17, %v643_v16 }
 0x489   :  { %1082 = vlog2.f32 %v647_v20 }
 0x493   :  { %v1083_v21 = vpop.eup %1082 }
 0x494   :  { %v649_v22 = vmul.f32 0.6931472, %v1083_v21 }
 0x496   :  { %v650_v23 = vadd.f32 %v649_v22, %v636_v4 }
 0x498   :  { %v651_v28 = vadd.f32 %v650_v23, %v628_v27 }
 0x49a   :  { %656 = vrot.lane.b32.xlu0 %v651_v28, %s1178_s0  ;;  %653 = vrot.lane.b32.xlu1 %v651_v28, %s1179_s1 }
 0x50c   :  { %v657_v29 = vpop.permute.xlu0 %656  ;;  %v654_v30 = vpop.permute.xlu1 %653 }
 0x50d   :  { %v655_v31 = vsel %vm533_vm15, %v654_v30, -1e+30  ;;  %v658_v33 = vsel %vm1387_vm1, %v657_v29, -1e+30 }
 0x50e   :  { %v659_v32 = vmax.f32 %v651_v28, %v655_v31 }
 0x510   :  { %v660_v34 = vmax.f32 %v659_v32, %v658_v33 }
 0x512   :  { %v661_v35 = vsub.f32 %v651_v28, %v660_v34  ;;  %v664_v15 = vsub.f32 %v655_v31, %v660_v34  ;;  %v668_v36 = vsub.f32 %v658_v33, %v660_v34  ;;  %v700_v31 = vld [vmem:[#allocation2 + $0xe] sm:$0x3] }
 0x514   :  { %v662_v37 = vmul.f32 1.442695, %v661_v35  ;;  %v665_v18 = vmul.f32 1.442695, %v664_v15  ;;  %v669_v38 = vmul.f32 1.442695, %v668_v36 }
 0x516   :  { %1084 = vpow2.f32 %v662_v37 }
 0x517   :  { %1086 = vpow2.f32 %v665_v18 }
 0x518   :  { %1088 = vpow2.f32 %v669_v38 }
 0x520   :  { %v1085_v25 = vpop.eup %1084 }
 0x521   :  { %v1087_v19 = vpop.eup %1086 }
 0x522   :  { %v667_v26 = vadd.f32 %v1087_v19, %v1085_v25  ;;  %v1089_v39 = vpop.eup %1088 }
 0x524   :  { %v671_v40 = vadd.f32 %v1089_v39, %v667_v26 }
 0x526   :  { %1090 = vlog2.f32 %v671_v40 }
 0x530   :  { %v1091_v41 = vpop.eup %1090 }
 0x531   :  { %v673_v14 = vmul.f32 0.6931472, %v1091_v41 }
 0x533   :  { %v674_v42 = vadd.f32 %v673_v14, %v660_v34 }
 0x535   :  { %v675_v44 = vadd.f32 %v674_v42, %v652_v43 }
 0x537   :  { %680 = vrot.lane.b32.xlu0 %v675_v44, %s1178_s0  ;;  %677 = vrot.lane.b32.xlu1 %v675_v44, %s1179_s1 }
 0x5a9   :  { %v681_v45 = vpop.permute.xlu0 %680  ;;  %v678_v46 = vpop.permute.xlu1 %677 }
 0x5aa   :  { %v679_v47 = vsel %vm533_vm15, %v678_v46, -1e+30  ;;  %v682_v49 = vsel %vm1387_vm1, %v681_v45, -1e+30 }
 0x5ab   :  { %v683_v48 = vmax.f32 %v675_v44, %v679_v47 }
 0x5ad   :  { %v684_v50 = vmax.f32 %v683_v48, %v682_v49 }
 0x5af   :  { %v685_v51 = vsub.f32 %v675_v44, %v684_v50  ;;  %v688_v52 = vsub.f32 %v679_v47, %v684_v50  ;;  %v692_v53 = vsub.f32 %v682_v49, %v684_v50  ;;  %v724_v47 = vld [vmem:[#allocation2 + $0x10] sm:$0x3] }
 0x5b1   :  { %v686_v54 = vmul.f32 1.442695, %v685_v51  ;;  %v689_v55 = vmul.f32 1.442695, %v688_v52  ;;  %v693_v56 = vmul.f32 1.442695, %v692_v53 }
 0x5b3   :  { %1092 = vpow2.f32 %v686_v54 }
 0x5b4   :  { %1094 = vpow2.f32 %v689_v55 }
 0x5b5   :  { %1096 = vpow2.f32 %v693_v56 }
 0x5bd   :  { %v1093_v57 = vpop.eup %1092 }
 0x5be   :  { %v1095_v58 = vpop.eup %1094 }
 0x5bf   :  { %v691_v60 = vadd.f32 %v1095_v58, %v1093_v57  ;;  %v1097_v61 = vpop.eup %1096 }
 0x5c1   :  { %v695_v62 = vadd.f32 %v1097_v61, %v691_v60 }
 0x5c3   :  { %1098 = vlog2.f32 %v695_v62 }
 0x5cd   :  { %v1099_v63 = vpop.eup %1098 }
 0x5ce   :  { %v697_v0 = vmul.f32 0.6931472, %v1099_v63 }
 0x5d0   :  { %v698_v1 = vadd.f32 %v697_v0, %v684_v50 }
 0x5d2   :  { %v699_v2 = vadd.f32 %v698_v1, %v676_v11 }
 0x5d4   :  { %704 = vrot.lane.b32.xlu0 %v699_v2, %s1178_s0  ;;  %701 = vrot.lane.b32.xlu1 %v699_v2, %s1179_s1 }
 0x646   :  { %v705_v3 = vpop.permute.xlu0 %704  ;;  %v702_v4 = vpop.permute.xlu1 %701 }
 0x647   :  { %v703_v5 = vsel %vm533_vm15, %v702_v4, -1e+30  ;;  %v706_v7 = vsel %vm1387_vm1, %v705_v3, -1e+30 }
 0x648   :  { %v707_v6 = vmax.f32 %v699_v2, %v703_v5 }
 0x64a   :  { %v708_v8 = vmax.f32 %v707_v6, %v706_v7 }
 0x64c   :  { %v709_v9 = vsub.f32 %v699_v2, %v708_v8  ;;  %v712_v10 = vsub.f32 %v703_v5, %v708_v8  ;;  %v716_v12 = vsub.f32 %v706_v7, %v708_v8  ;;  %v748_v5 = vld [vmem:[#allocation2 + $0x12] sm:$0x3] }
 0x64e   :  { %v710_v13 = vmul.f32 1.442695, %v709_v9  ;;  %v713_v16 = vmul.f32 1.442695, %v712_v10  ;;  %v717_v17 = vmul.f32 1.442695, %v716_v12 }
 0x650   :  { %1100 = vpow2.f32 %v710_v13 }
 0x651   :  { %1102 = vpow2.f32 %v713_v16 }
 0x652   :  { %1104 = vpow2.f32 %v717_v17 }
 0x65a   :  { %v1101_v20 = vpop.eup %1100 }
 0x65b   :  { %v1103_v21 = vpop.eup %1102 }
 0x65c   :  { %v715_v22 = vadd.f32 %v1103_v21, %v1101_v20  ;;  %v1105_v23 = vpop.eup %1104 }
 0x65e   :  { %v719_v27 = vadd.f32 %v1105_v23, %v715_v22 }
 0x660   :  { %1106 = vlog2.f32 %v719_v27 }
 0x66a   :  { %v1107_v28 = vpop.eup %1106 }
 0x66b   :  { %v721_v29 = vmul.f32 0.6931472, %v1107_v28 }
 0x66d   :  { %v722_v30 = vadd.f32 %v721_v29, %v708_v8 }
 0x66f   :  { %v723_v32 = vadd.f32 %v722_v30, %v700_v31 }
 0x671   :  { %728 = vrot.lane.b32.xlu0 %v723_v32, %s1178_s0  ;;  %725 = vrot.lane.b32.xlu1 %v723_v32, %s1179_s1 }
 0x6e3   :  { %v729_v33 = vpop.permute.xlu0 %728  ;;  %v726_v34 = vpop.permute.xlu1 %725 }
 0x6e4   :  { %v727_v35 = vsel %vm533_vm15, %v726_v34, -1e+30  ;;  %v730_v36 = vsel %vm1387_vm1, %v729_v33, -1e+30 }
 0x6e5   :  { %v731_v15 = vmax.f32 %v723_v32, %v727_v35 }
 0x6e7   :  { %v732_v37 = vmax.f32 %v731_v15, %v730_v36 }
 0x6e9   :  { %v733_v18 = vsub.f32 %v723_v32, %v732_v37  ;;  %v736_v38 = vsub.f32 %v727_v35, %v732_v37  ;;  %v740_v25 = vsub.f32 %v730_v36, %v732_v37  ;;  %v772_v35 = vld [vmem:[#allocation2 + $0x14] sm:$0x3] }
 0x6eb   :  { %v734_v19 = vmul.f32 1.442695, %v733_v18  ;;  %v737_v26 = vmul.f32 1.442695, %v736_v38  ;;  %v741_v39 = vmul.f32 1.442695, %v740_v25 }
 0x6ed   :  { %1108 = vpow2.f32 %v734_v19 }
 0x6ee   :  { %1110 = vpow2.f32 %v737_v26 }
 0x6ef   :  { %1112 = vpow2.f32 %v741_v39 }
 0x6f7   :  { %v1109_v40 = vpop.eup %1108 }
 0x6f8   :  { %v1111_v41 = vpop.eup %1110 }
 0x6f9   :  { %v739_v14 = vadd.f32 %v1111_v41, %v1109_v40  ;;  %v1113_v42 = vpop.eup %1112 }
 0x6fb   :  { %v743_v43 = vadd.f32 %v1113_v42, %v739_v14 }
 0x6fd   :  { %1114 = vlog2.f32 %v743_v43 }
 0x707   :  { %v1115_v44 = vpop.eup %1114 }
 0x708   :  { %v745_v45 = vmul.f32 0.6931472, %v1115_v44 }
 0x70a   :  { %v746_v46 = vadd.f32 %v745_v45, %v732_v37 }
 0x70c   :  { %v747_v48 = vadd.f32 %v746_v46, %v724_v47 }
 0x70e   :  { %752 = vrot.lane.b32.xlu0 %v747_v48, %s1178_s0  ;;  %749 = vrot.lane.b32.xlu1 %v747_v48, %s1179_s1 }
 0x780   :  { %v753_v49 = vpop.permute.xlu0 %752  ;;  %v750_v50 = vpop.permute.xlu1 %749 }
 0x781   :  { %v751_v51 = vsel %vm533_vm15, %v750_v50, -1e+30  ;;  %v754_v53 = vsel %vm1387_vm1, %v753_v49, -1e+30 }
 0x782   :  { %v755_v52 = vmax.f32 %v747_v48, %v751_v51 }
 0x784   :  { %v756_v54 = vmax.f32 %v755_v52, %v754_v53 }
 0x786   :  { %v757_v55 = vsub.f32 %v747_v48, %v756_v54  ;;  %v760_v56 = vsub.f32 %v751_v51, %v756_v54  ;;  %v764_v57 = vsub.f32 %v754_v53, %v756_v54  ;;  %v796_v51 = vld [vmem:[#allocation2 + $0x16] sm:$0x3] }
 0x788   :  { %v758_v58 = vmul.f32 1.442695, %v757_v55  ;;  %v761_v60 = vmul.f32 1.442695, %v760_v56  ;;  %v765_v61 = vmul.f32 1.442695, %v764_v57 }
 0x78a   :  { %1116 = vpow2.f32 %v758_v58 }
 0x78b   :  { %1118 = vpow2.f32 %v761_v60 }
 0x78c   :  { %1120 = vpow2.f32 %v765_v61 }
 0x794   :  { %v1117_v62 = vpop.eup %1116 }
 0x795   :  { %v1119_v63 = vpop.eup %1118 }
 0x796   :  { %v763_v0 = vadd.f32 %v1119_v63, %v1117_v62  ;;  %v1121_v1 = vpop.eup %1120 }
 0x798   :  { %v767_v11 = vadd.f32 %v1121_v1, %v763_v0 }
 0x79a   :  { %1122 = vlog2.f32 %v767_v11 }
 0x7a4   :  { %v1123_v2 = vpop.eup %1122 }
 0x7a5   :  { %v769_v3 = vmul.f32 0.6931472, %v1123_v2 }
 0x7a7   :  { %v770_v4 = vadd.f32 %v769_v3, %v756_v54 }
 0x7a9   :  { %v771_v6 = vadd.f32 %v770_v4, %v748_v5 }
 0x7ab   :  { %776 = vrot.lane.b32.xlu0 %v771_v6, %s1178_s0  ;;  %773 = vrot.lane.b32.xlu1 %v771_v6, %s1179_s1 }
 0x81d   :  { %v777_v7 = vpop.permute.xlu0 %776  ;;  %v774_v8 = vpop.permute.xlu1 %773 }
 0x81e   :  { %v775_v9 = vsel %vm533_vm15, %v774_v8, -1e+30  ;;  %v778_v12 = vsel %vm1387_vm1, %v777_v7, -1e+30 }
 0x81f   :  { %v779_v10 = vmax.f32 %v771_v6, %v775_v9 }
 0x821   :  { %v780_v13 = vmax.f32 %v779_v10, %v778_v12 }
 0x823   :  { %v781_v16 = vsub.f32 %v771_v6, %v780_v13  ;;  %v784_v17 = vsub.f32 %v775_v9, %v780_v13  ;;  %v788_v20 = vsub.f32 %v778_v12, %v780_v13  ;;  %v820_v9 = vld [vmem:[#allocation2 + $0x18] sm:$0x3] }
 0x825   :  { %v782_v21 = vmul.f32 1.442695, %v781_v16  ;;  %v785_v22 = vmul.f32 1.442695, %v784_v17  ;;  %v789_v23 = vmul.f32 1.442695, %v788_v20 }
 0x827   :  { %1124 = vpow2.f32 %v782_v21 }
 0x828   :  { %1126 = vpow2.f32 %v785_v22 }
 0x829   :  { %1128 = vpow2.f32 %v789_v23 }
 0x831   :  { %v1125_v27 = vpop.eup %1124 }
 0x832   :  { %v1127_v28 = vpop.eup %1126 }
 0x833   :  { %v787_v29 = vadd.f32 %v1127_v28, %v1125_v27  ;;  %v1129_v30 = vpop.eup %1128 }
 0x835   :  { %v791_v31 = vadd.f32 %v1129_v30, %v787_v29 }
 0x837   :  { %1130 = vlog2.f32 %v791_v31 }
 0x841   :  { %v1131_v32 = vpop.eup %1130 }
 0x842   :  { %v793_v33 = vmul.f32 0.6931472, %v1131_v32 }
 0x844   :  { %v794_v34 = vadd.f32 %v793_v33, %v780_v13 }
 0x846   :  { %v795_v15 = vadd.f32 %v794_v34, %v772_v35 }
 0x848   :  { %800 = vrot.lane.b32.xlu0 %v795_v15, %s1178_s0  ;;  %797 = vrot.lane.b32.xlu1 %v795_v15, %s1179_s1 }
 0x8ba   :  { %v801_v36 = vpop.permute.xlu0 %800  ;;  %v798_v37 = vpop.permute.xlu1 %797 }
 0x8bb   :  { %v799_v18 = vsel %vm533_vm15, %v798_v37, -1e+30  ;;  %v802_v25 = vsel %vm1387_vm1, %v801_v36, -1e+30 }
 0x8bc   :  { %v803_v38 = vmax.f32 %v795_v15, %v799_v18 }
 0x8be   :  { %v804_v19 = vmax.f32 %v803_v38, %v802_v25 }
 0x8c0   :  { %v805_v26 = vsub.f32 %v795_v15, %v804_v19  ;;  %v808_v39 = vsub.f32 %v799_v18, %v804_v19  ;;  %v812_v40 = vsub.f32 %v802_v25, %v804_v19  ;;  %v844_v18 = vld [vmem:[#allocation2 + $0x1a] sm:$0x3]  ;;  %v1180_v25 = vmov 0  }
 0x8c1   :  { %1035 = vset.pattern.permute.xlu0 %v1180_v25  ;;  %1034 = vset.pattern.permute.xlu1 %v1180_v25 }
 0x8c2   :  { %v806_v41 = vmul.f32 1.442695, %v805_v26  ;;  %v809_v14 = vmul.f32 1.442695, %v808_v39  ;;  %v813_v42 = vmul.f32 1.442695, %v812_v40 }
 0x8c4   :  { %1132 = vpow2.f32 %v806_v41 }
 0x8c5   :  { %1134 = vpow2.f32 %v809_v14 }
 0x8c6   :  { %1136 = vpow2.f32 %v813_v42 }
 0x8ce   :  { %v1133_v43 = vpop.eup %1132 }
 0x8cf   :  { %v1135_v44 = vpop.eup %1134 }
 0x8d0   :  { %v811_v45 = vadd.f32 %v1135_v44, %v1133_v43  ;;  %v1137_v46 = vpop.eup %1136 }
 0x8d2   :  { %v815_v47 = vadd.f32 %v1137_v46, %v811_v45 }
 0x8d4   :  { %1138 = vlog2.f32 %v815_v47 }
 0x8de   :  { %v1139_v48 = vpop.eup %1138 }
 0x8df   :  { %v817_v49 = vmul.f32 0.6931472, %v1139_v48 }
 0x8e1   :  { %v818_v50 = vadd.f32 %v817_v49, %v804_v19 }
 0x8e3   :  { %v819_v52 = vadd.f32 %v818_v50, %v796_v51 }
 0x8e5   :  { %824 = vrot.lane.b32.xlu0 %v819_v52, %s1178_s0  ;;  %821 = vrot.lane.b32.xlu1 %v819_v52, %s1179_s1 }
 0x957   :  { %v825_v53 = vpop.permute.xlu0 %824  ;;  %v822_v54 = vpop.permute.xlu1 %821 }
 0x958   :  { %v823_v55 = vsel %vm533_vm15, %v822_v54, -1e+30  ;;  %v826_v57 = vsel %vm1387_vm1, %v825_v53, -1e+30  ;;  %v541_v54 = vld [vmem:[%s1489_s2] sm:$0x3] }
 0x959   :  { %v827_v56 = vmax.f32 %v819_v52, %v823_v55 }
 0x95b   :  { %v828_v58 = vmax.f32 %v827_v56, %v826_v57 }
 0x95d   :  { %v829_v60 = vsub.f32 %v819_v52, %v828_v58  ;;  %v832_v61 = vsub.f32 %v823_v55, %v828_v58  ;;  %v836_v62 = vsub.f32 %v826_v57, %v828_v58  ;;  %v542_v57 = vmul.u32 2, %v541_v54 }
 0x95f   :  { %v830_v63 = vmul.f32 1.442695, %v829_v60  ;;  %v833_v0 = vmul.f32 1.442695, %v832_v61  ;;  %v837_v1 = vmul.f32 1.442695, %v836_v62 }
 0x960   :  { %v970_v61 = vadd.s32 4294967295, %v542_v57 }
 0x961   :  { %1140 = vpow2.f32 %v830_v63 }
 0x962   :  { %1142 = vpow2.f32 %v833_v0 }
 0x963   :  { %1144 = vpow2.f32 %v837_v1 }
 0x96b   :  { %v1141_v11 = vpop.eup %1140 }
 0x96c   :  { %v1143_v2 = vpop.eup %1142 }
 0x96d   :  { %v835_v3 = vadd.f32 %v1143_v2, %v1141_v11  ;;  %v1145_v4 = vpop.eup %1144 }
 0x96f   :  { %v839_v5 = vadd.f32 %v1145_v4, %v835_v3 }
 0x971   :  { %1146 = vlog2.f32 %v839_v5 }
 0x97b   :  { %v1147_v6 = vpop.eup %1146 }
 0x97c   :  { %v841_v7 = vmul.f32 0.6931472, %v1147_v6 }
 0x97e   :  { %v842_v8 = vadd.f32 %v841_v7, %v828_v58  ;;  %v868_v58 = vld [vmem:[#allocation2 + $0x1c] sm:$0x3] }
 0x980   :  { %v843_v10 = vadd.f32 %v842_v8, %v820_v9 }
 0x982   :  { %848 = vrot.lane.b32.xlu0 %v843_v10, %s1178_s0  ;;  %845 = vrot.lane.b32.xlu1 %v843_v10, %s1179_s1 }
 0x9f4   :  { %v849_v12 = vpop.permute.xlu0 %848  ;;  %v846_v13 = vpop.permute.xlu1 %845 }
 0x9f5   :  { %v847_v16 = vsel %vm533_vm15, %v846_v13, -1e+30  ;;  %v850_v20 = vsel %vm1387_vm1, %v849_v12, -1e+30 }
 0x9f6   :  { %v851_v17 = vmax.f32 %v843_v10, %v847_v16 }
 0x9f8   :  { %v852_v21 = vmax.f32 %v851_v17, %v850_v20 }
 0x9fa   :  { %v853_v22 = vsub.f32 %v843_v10, %v852_v21  ;;  %v856_v23 = vsub.f32 %v847_v16, %v852_v21  ;;  %v860_v27 = vsub.f32 %v850_v20, %v852_v21 }
 0x9fc   :  { %v854_v28 = vmul.f32 1.442695, %v853_v22  ;;  %v857_v29 = vmul.f32 1.442695, %v856_v23  ;;  %v861_v30 = vmul.f32 1.442695, %v860_v27 }
 0x9fd   :  { %v892_v23 = vld [vmem:[#allocation2 + $0x1e] sm:$0x3] }
 0x9fe   :  { %1148 = vpow2.f32 %v854_v28 }
 0x9ff   :  { %1150 = vpow2.f32 %v857_v29 }
 0xa00   :  { %1152 = vpow2.f32 %v861_v30 }
 0xa08   :  { %v1149_v31 = vpop.eup %1148 }
 0xa09   :  { %v1151_v32 = vpop.eup %1150 }
 0xa0a   :  { %v859_v33 = vadd.f32 %v1151_v32, %v1149_v31  ;;  %v1153_v34 = vpop.eup %1152 }
 0xa0c   :  { %v863_v35 = vadd.f32 %v1153_v34, %v859_v33 }
 0xa0e   :  { %1154 = vlog2.f32 %v863_v35 }
 0xa18   :  { %v1155_v15 = vpop.eup %1154 }
 0xa19   :  { %v865_v36 = vmul.f32 0.6931472, %v1155_v15 }
 0xa1b   :  { %v866_v37 = vadd.f32 %v865_v36, %v852_v21 }
 0xa1d   :  { %v867_v38 = vadd.f32 %v866_v37, %v844_v18 }
 0xa1f   :  { %872 = vrot.lane.b32.xlu0 %v867_v38, %s1178_s0  ;;  %869 = vrot.lane.b32.xlu1 %v867_v38, %s1179_s1 }
 0xa91   :  { %v873_v19 = vpop.permute.xlu0 %872  ;;  %v870_v26 = vpop.permute.xlu1 %869 }
 0xa92   :  { %v871_v39 = vsel %vm533_vm15, %v870_v26, -1e+30  ;;  %v874_v41 = vsel %vm1387_vm1, %v873_v19, -1e+30 }
 0xa93   :  { %v875_v40 = vmax.f32 %v867_v38, %v871_v39 }
 0xa95   :  { %v876_v14 = vmax.f32 %v875_v40, %v874_v41 }
 0xa97   :  { %v877_v42 = vsub.f32 %v867_v38, %v876_v14  ;;  %v880_v43 = vsub.f32 %v871_v39, %v876_v14  ;;  %v884_v44 = vsub.f32 %v874_v41, %v876_v14 }
 0xa99   :  { %v878_v45 = vmul.f32 1.442695, %v877_v42  ;;  %v881_v46 = vmul.f32 1.442695, %v880_v43  ;;  %v885_v47 = vmul.f32 1.442695, %v884_v44 }
 0xa9b   :  { %1156 = vpow2.f32 %v878_v45 }
 0xa9c   :  { %1158 = vpow2.f32 %v881_v46 }
 0xa9d   :  { %1160 = vpow2.f32 %v885_v47 }
 0xaa5   :  { %v1157_v48 = vpop.eup %1156 }
 0xaa6   :  { %v1159_v49 = vpop.eup %1158 }
 0xaa7   :  { %v883_v50 = vadd.f32 %v1159_v49, %v1157_v48  ;;  %v1161_v51 = vpop.eup %1160 }
 0xaa9   :  { %v887_v52 = vadd.f32 %v1161_v51, %v883_v50 }
 0xaab   :  { %1162 = vlog2.f32 %v887_v52 }
 0xab5   :  { %v1163_v53 = vpop.eup %1162 }
 0xab6   :  { %v889_v55 = vmul.f32 0.6931472, %v1163_v53 }
 0xab8   :  { %v890_v56 = vadd.f32 %v889_v55, %v876_v14 }
 0xaba   :  { %v891_v60 = vadd.f32 %v890_v56, %v868_v58 }
 0xabc   :  { %896 = vrot.lane.b32.xlu0 %v891_v60, %s1178_s0  ;;  %893 = vrot.lane.b32.xlu1 %v891_v60, %s1179_s1 }
 0xac0   :  { %549 = vperm.xlu0 %1035, %v970_v61   ;;  %544 = vperm.xlu1 %1034, %v542_v57  }
 0xb2e   :  { %v897_v62 = vpop.permute.xlu0 %896  ;;  %v894_v63 = vpop.permute.xlu1 %893 }
 0xb2f   :  { %v895_v0 = vsel %vm533_vm15, %v894_v63, -1e+30  ;;  %v898_v11 = vsel %vm1387_vm1, %v897_v62, -1e+30 }
 0xb30   :  { %v899_v1 = vmax.f32 %v891_v60, %v895_v0 }
 0xb32   :  { %v900_v2 = vmax.f32 %v899_v1, %v898_v11 }
 0xb34   :  { %v901_v3 = vsub.f32 %v891_v60, %v900_v2  ;;  %v904_v4 = vsub.f32 %v895_v0, %v900_v2  ;;  %v908_v5 = vsub.f32 %v898_v11, %v900_v2 }
 0xb36   :  { %v902_v6 = vmul.f32 1.442695, %v901_v3  ;;  %v905_v7 = vmul.f32 1.442695, %v904_v4  ;;  %v909_v8 = vmul.f32 1.442695, %v908_v5 }
 0xb38   :  { %1164 = vpow2.f32 %v902_v6 }
 0xb39   :  { %1166 = vpow2.f32 %v905_v7 }
 0xb3a   :  { %1168 = vpow2.f32 %v909_v8 }
 0xb3f   :  { %v550_v17 = vpop.permute.xlu0 %549  ;;  %v545_v20 = vpop.permute.xlu1 %544 }
 0xb40   :  { %vm551_vm2 = vcmp.eq.s32.totalorder %v1248_v24, %v550_v17  ;;  %vm546_vm3 = vcmp.eq.s32.totalorder %v1248_v24, %v545_v20 }
 0xb41   :  { %vm552_vm4 = vmor %vm546_vm3, %vm551_vm2 }
 0xb42   :  { %v1165_v9 = vpop.eup %1164 }
 0xb43   :  { %v1167_v10 = vpop.eup %1166 }
 0xb44   :  { %v907_v12 = vadd.f32 %v1167_v10, %v1165_v9  ;;  %v1169_v13 = vpop.eup %1168 }
 0xb46   :  { %v911_v16 = vadd.f32 %v1169_v13, %v907_v12 }
 0xb48   :  { %1170 = vlog2.f32 %v911_v16 }
 0xb52   :  { %v1171_v59 = vpop.eup %1170 }
 0xb53   :  { %v913_v21 = vmul.f32 0.6931472, %v1171_v59 }
 0xb55   :  { %v914_v22 = vadd.f32 %v913_v21, %v900_v2 }
 0xb57   :  { %v915_v27 = vadd.f32 %v914_v22, %v892_v23 }
 0xb59   :  { %v916_v28 = vsel %vm552_vm4, %v915_v27, -1e+30 }
 0xb5a   :  { %v918_v29 = vsel %vm917_vm5, %v916_v28, -inf }
 0xb5b   :  { %919 = vmax.xlane.f32.xlu1 %v918_v29 }
 0xbe8   :  { %v920_v30 = vpop.xlane.xlu1 %919 }
 0xbe9   :  { %v921_v31 = vsub.f32 %v916_v28, %v920_v30 }
 0xbeb   :  { %v922_v32 = vmul.f32 1.442695, %v921_v31 }
 0xbed   :  { %1172 = vpow2.f32 %v922_v32 }
 0xbf7   :  { %v1173_v33 = vpop.eup %1172 }
 0xbf8   :  { %v924_v34 = vsel %vm917_vm5, %v1173_v33, 0.0 }
 0xbf9   :  { %925 = vadd.xlane.f32.xlu0 %v924_v34 }
 0xc86   :  { %v926_v35 = vpop.xlane.xlu0 %925 }
 0xc87   :  { %1174 = vlog2.f32 %v926_v35 }
 0xc91   :  { %v1175_v15 = vpop.eup %1174 }
 0xc92   :  { %v928_v24 = vmul.f32 0.6931472, %v1175_v15 }
 0xc94   :  { %v929_v36 = vadd.f32 %v928_v24, %v920_v30 }
 0xc96   :  { %v930_v37 = vsub.f32 0.0, %v929_v36 }
 0xc98   :  { %931 = vst [vmem:[%s1490_s3] sm:$0x3] %v930_v37 }

</bundles_post_ra>
